<compile_context>
chip_gen: v5e
topology: v5e:2x2
jax: 0.10.0
libtpu: 0.0.40
codegen_flags: <defaults>
</compile_context>

<pallas_src>
import functools

import jax
import jax.numpy as jnp
from jax import lax
from jax.experimental import pallas as pl
from jax.experimental.pallas import tpu as pltpu


def _round_up(x, m):
    return ((x + m - 1) // m) * m


def _pick_sub_block():
    # v5e/v5p MXU is 128x128, so a 256-wide triangular matmul wastes MACs there;
    # v6e/v7x have a native 256x256 MXU.
    try:
        kind = jax.devices()[0].device_kind.lower()
    except Exception:
        return 256
    return 128 if "v5" in kind else 256


# ----------------------------------------------------------------------------
# Kernel 1: packed per-class sort keys (err bits | fg bit | bg bit)
#           + per-tile foreground counts (fused gts partials)
# ----------------------------------------------------------------------------
def _class_maps_kernel(ignore_label, probas_ref, labels_ref, key_ref, gts_ref):
    p = probas_ref[0]                       # (C, T) f32 class probabilities
    lab = labels_ref[0]                     # (1, T) i32 labels
    C, T = p.shape
    cls = lax.broadcasted_iota(jnp.int32, (C, T), 0)
    lab_b = jnp.broadcast_to(lab, (C, T))
    valid = lab_b != ignore_label
    is_fg = jnp.logical_and(lab_b == cls, valid)
    is_bg = jnp.logical_and(valid, jnp.logical_not(is_fg))
    fg = jnp.where(is_fg, 1.0, 0.0)
    err = jnp.where(valid, jnp.abs(fg - p), 0.0)       # 0 at ignored / padded
    # err >= 0 so its f32 bit pattern is monotone as uint32; stuff the fg/bg
    # flags into the 2 lowest mantissa bits (<= 2^-22 relative perturbation).
    bits = pltpu.bitcast(err, jnp.uint32) & jnp.uint32(0xFFFFFFFC)
    key_ref[...] = (bits
                    | jnp.where(is_fg, jnp.uint32(2), jnp.uint32(0))
                    | jnp.where(is_bg, jnp.uint32(1), jnp.uint32(0)))
    # Per-tile foreground count per class: the mask is already in VMEM, so this
    # removes a full C*P*4-byte HBM re-read in the wrapper.
    gts_ref[0, 0] = jnp.sum(fg, axis=1, keepdims=True)            # (C, 1)


# ----------------------------------------------------------------------------
# Kernel 2: tiled carry scan over the sorted keys (Lovasz extension)
# ----------------------------------------------------------------------------
def _lovasz_scan_kernel(use_present, sub_block, gts_ref, key_ref, out_ref,
                        cum_mat_ref, cfg_ref, cbg_ref, loss_ref):
    t = pl.program_id(0)
    SB = sub_block
    C, tile = key_ref.shape

    @pl.when(t == 0)
    def _init():
        row = lax.broadcasted_iota(jnp.int32, (SB, SB), 0)
        col = lax.broadcasted_iota(jnp.int32, (SB, SB), 1)
        cum_mat_ref[...] = (row <= col).astype(jnp.float32)  # inclusive prefix sum
        cfg_ref[...] = jnp.zeros_like(cfg_ref)
        cbg_ref[...] = jnp.zeros_like(cbg_ref)
        loss_ref[...] = jnp.zeros_like(loss_ref)

    gts = gts_ref[...]                      # (C, 1) total foreground per class
    cm = cum_mat_ref[...]                   # (SB, SB) triangular constant

    def body(k, carry):
        cf, cb, acc = carry                 # each (C, 1) f32
        off = pl.multiple_of(k * SB, SB)
        key = key_ref[:, pl.ds(off, SB)]                        # (C, SB) u32
        fg = jnp.where((key & jnp.uint32(2)) != 0, 1.0, 0.0)
        bg = jnp.where((key & jnp.uint32(1)) != 0, 1.0, 0.0)
        err = pltpu.bitcast(key & jnp.uint32(0xFFFFFFFC), jnp.float32)
        # One fused MXU call for both prefix sums (0/1 inputs -> exact).
        both_in = jnp.dot(jnp.concatenate([fg, bg], axis=0), cm,
                          preferred_element_type=jnp.float32)   # (2C, SB)
        cf_in = cf + both_in[:C]
        cb_in = cb + both_in[C:]
        cf_ex = cf_in - fg
        cb_ex = cb_in - bg
        # lovasz_grad = jaccard[j] - jaccard[j-1], formed element-wise over a
        # common denominator (one exact divide per element):
        #   jac_in - jac_ex = (a_ex*bg + fg*u_ex) / (u_in * u_ex)
        # with a_ex = gts - cf_ex, u_ex = gts + cb_ex, u_in = gts + cb_in.
        # (grad[0] == jaccard[0] falls out of cf_ex = cb_ex = 0 globally.)
        a_ex = gts - cf_ex
        u_ex = gts + cb_ex
        u_in = gts + cb_in
        num = a_ex * bg + fg * u_ex
        den = jnp.maximum(u_in, 1e-9) * jnp.maximum(u_ex, 1e-9)
        acc = acc + jnp.sum(err * (num / den), axis=1, keepdims=True)
        # The inclusive cumsum's last column is the running total -> carries
        # come straight from the matmul result (no extra cross-lane reduces).
        cf = cf_in[:, SB - 1:SB]
        cb = cb_in[:, SB - 1:SB]
        return cf, cb, acc

    cf, cb, acc = lax.fori_loop(0, tile // SB, body,
                                (cfg_ref[...], cbg_ref[...], jnp.zeros_like(gts)),
                                unroll=2)
    cfg_ref[...] = cf
    cbg_ref[...] = cb
    loss_ref[...] += acc

    @pl.when(t == pl.num_programs(0) - 1)
    def _finalize():
        if use_present:
            present = jnp.where(gts > 0.0, 1.0, 0.0)      # classes='present'
        else:
            present = jnp.ones_like(gts)                  # classes='all'
        num = jnp.sum(loss_ref[...] * present, keepdims=True)        # (1, 1)
        den = jnp.maximum(jnp.sum(present, keepdims=True), 1.0)      # (1, 1)
        out_ref[...] = num / den


# ----------------------------------------------------------------------------
# Wrapper mirroring model/fusion_net.py::Lovasz_Softmax.forward
# ----------------------------------------------------------------------------
def _lovasz_single(probas, labels, classes, ignore_label):
    B, C, H, W = probas.shape
    HW = H * W
    SB = _pick_sub_block()                 # 128 on v5*, 256 on v6e/v7x
    # Large lane tiles (up to 8K) keep both kernels near the HBM roofline while
    # staying far below the v7x 64 MiB VMEM ceiling (double-buffered blocks are
    # ~C*64 KiB each). 512 is a multiple of both SB choices and 128 lanes.
    tile = min(8192, _round_up(HW, 512))
    hw_pad = _round_up(HW, tile)
    nt = hw_pad // tile
    p_total = B * hw_pad

    probas_r = probas.reshape(B, C, HW).astype(jnp.float32)
    labels_r = labels.reshape(B, 1, HW).astype(jnp.int32)
    if hw_pad != HW:                       # padded pixels flagged as ignored
        probas_r = jnp.pad(probas_r, ((0, 0), (0, 0), (0, hw_pad - HW)))
        labels_r = jnp.pad(labels_r, ((0, 0), (0, 0), (0, hw_pad - HW)),
                           constant_values=ignore_label)

    keys, gts_part = pl.pallas_call(
        functools.partial(_class_maps_kernel, ignore_label),
        out_shape=(jax.ShapeDtypeStruct((C, p_total), jnp.uint32),
                   jax.ShapeDtypeStruct((B, nt, C, 1), jnp.float32)),
        grid=(B, nt),
        in_specs=[pl.BlockSpec((1, C, tile), lambda b, t: (b, 0, t)),
                  pl.BlockSpec((1, 1, tile), lambda b, t: (b, 0, t))],
        out_specs=(pl.BlockSpec((C, tile), lambda b, t: (0, b * nt + t)),
                   pl.BlockSpec((1, 1, C, 1), lambda b, t: (b, t, 0, 0))),
        compiler_params=pltpu.CompilerParams(
            dimension_semantics=("parallel", "parallel"),
            vmem_limit_bytes=48 * 1024 * 1024),
    )(probas_r, labels_r)

    # Total foreground count per class from the per-tile partials (order
    # independent; each partial <= tile so the f32 sums stay exact).
    gts = jnp.sum(gts_part[:, :, :, 0], axis=(0, 1)).reshape(C, 1)

    # TODO(synk): TPU Pallas has no sort primitive; the per-class descending
    # sort of the packed keys runs as a single XLA value-sort (no gathers).
    keys_sorted = jnp.sort(keys, axis=1, descending=True)

    # TODO(synk): on v7x the independent classes could be split across the two
    # TensorCores via an extra "parallel" class-block axis; kept single-scan
    # here since v5e/v6e have one TC and the XLA sort dominates end-to-end.
    loss = pl.pallas_call(
        functools.partial(_lovasz_scan_kernel, classes == 'present', SB),
        out_shape=jax.ShapeDtypeStruct((1, 1), jnp.float32),
        grid=(p_total // tile,),
        in_specs=[pl.BlockSpec((C, 1), lambda t: (0, 0)),
                  pl.BlockSpec((C, tile), lambda t: (0, t))],
        out_specs=pl.BlockSpec((1, 1), lambda t: (0, 0)),
        scratch_shapes=[pltpu.VMEM((SB, SB), jnp.float32),
                        pltpu.VMEM((C, 1), jnp.float32),
                        pltpu.VMEM((C, 1), jnp.float32),
                        pltpu.VMEM((C, 1), jnp.float32)],
        compiler_params=pltpu.CompilerParams(
            dimension_semantics=("arbitrary",),
            vmem_limit_bytes=48 * 1024 * 1024),
    )(gts, keys_sorted)
    return loss[0, 0]


_lovasz_single_jit = jax.jit(_lovasz_single, static_argnums=(2, 3))


@functools.partial(jax.jit, static_argnums=(2, 3))
def _lovasz_per_image_jit(probas, labels, classes, ignore_label):
    # All per-image pipelines traced inside one jit: one dispatch, sorts can
    # overlap. TODO(synk): a fully batched variant (extra grid axis + batched
    # sort) would remove the remaining per-image duplication.
    B = probas.shape[0]
    losses = [_lovasz_single(probas[b:b + 1], labels[b:b + 1],
                             classes, ignore_label) for b in range(B)]
    return jnp.mean(jnp.stack(losses))


def lovasz_softmax(output, target, classes='present', per_class=False, ignore_label=0):
    # TODO(synk): explicit class-list averaging (classes=[...]) is not supported,
    # only 'present' / 'all'.
    if not isinstance(classes, str):
        raise NotImplementedError("classes must be 'present' or 'all'")
    if per_class:
        # per_class == per-image averaging in the reference code.
        return _lovasz_per_image_jit(output, target, classes, ignore_label)
    return _lovasz_single_jit(output, target, classes, ignore_label)


class Lovasz_Softmax:
    def __init__(self, classes='present', per_class=False, ignore_label=0):
        self.classes = classes
        self.per_class = per_class
        self.ignore_label = ignore_label

    def __call__(self, output, target):
        return lovasz_softmax(output, target, self.classes,
                              self.per_class, self.ignore_label)


# ----------------------------------------------------------------------------
# Pure-JAX reference (mirrors the PyTorch lovasz_softmax) for verification
# ----------------------------------------------------------------------------
def _lovasz_reference(probas, labels, classes='present', ignore=0):
    B, C, H, W = probas.shape
    pr = jnp.transpose(probas, (0, 2, 3, 1)).reshape(-1, C)
    lb = labels.reshape(-1)
    keep = lb != ignore
    vpr = pr[keep]
    vlb = lb[keep]
    losses = []
    for c in range(C):
        fg = (vlb == c).astype(jnp.float32)
        if classes == 'present' and float(fg.sum()) == 0:
            continue
        errors = jnp.abs(fg - vpr[:, c])
        order = jnp.argsort(-errors)
        es = errors[order]
        fs = fg[order]
        gts = fs.sum()
        inter = gts - jnp.cumsum(fs)
        union = gts + jnp.cumsum(1.0 - fs)
        jac = 1.0 - inter / union
        jac = jnp.concatenate([jac[:1], jac[1:] - jac[:-1]])
        losses.append(jnp.dot(es, jac))
    if not losses:
        return jnp.float32(0.0)
    return jnp.mean(jnp.stack(losses))


if __name__ == "__main__":
    key = jax.random.PRNGKey(0)
    k1, k2 = jax.random.split(key)
    B, C, H, W = 2, 4, 16, 16
    logits = jax.random.normal(k1, (B, C, H, W), dtype=jnp.float32)
    probas = jax.nn.softmax(logits, axis=1)                  # NCHW probabilities
    labels = jax.random.randint(k2, (B, H, W), 0, C, dtype=jnp.int32)

    # per-batch loss
    loss_mod = Lovasz_Softmax(classes='present', per_class=False, ignore_label=0)
    loss = jax.block_until_ready(loss_mod(probas, labels))
    ref = _lovasz_reference(probas, labels, classes='present', ignore=0)
    assert bool(jnp.isfinite(loss))
    assert abs(float(loss) - float(ref)) < 1e-3, (float(loss), float(ref))

    # per-image averaging path
    loss_pi_mod = Lovasz_Softmax(classes='present', per_class=True, ignore_label=0)
    loss_pi = jax.block_until_ready(loss_pi_mod(probas, labels))
    ref_pi = jnp.mean(jnp.stack(
        [_lovasz_reference(probas[b:b + 1], labels[b:b + 1], 'present', 0)
         for b in range(B)]))
    assert abs(float(loss_pi) - float(ref_pi)) < 1e-3, (float(loss_pi), float(ref_pi))

    print("KERNEL_OK")
</pallas_src>

<mosaic_0001>
module attributes {stable_mosaic.version = 11 : i64} {
  func.func @_class_maps_kernel(%arg0: i32, %arg1: i32, %arg2: memref<1x4x512xf32, #tpu.memory_space<vmem>>, %arg3: memref<1x1x512xi32, #tpu.memory_space<vmem>>, %arg4: memref<4x512xi32, #tpu.memory_space<vmem>>, %arg5: memref<1x1x4x1xf32, #tpu.memory_space<vmem>>) attributes {dimension_semantics = [#tpu.dimension_semantics<parallel>, #tpu.dimension_semantics<parallel>], iteration_bounds = array<i64: 2, 1>, scalar_prefetch = 0 : i64, scratch_operands = 0 : i64, tpu.core_type = #tpu.core_type<tc>, window_params = [{transform_indices = @transform_0, window_bounds = array<i64: 1, 4, 512>}, {transform_indices = @transform_1, window_bounds = array<i64: 1, 1, 512>}, {transform_indices = @transform_2, window_bounds = array<i64: 4, 512>}, {transform_indices = @transform_3, window_bounds = array<i64: 1, 1, 4, 1>}]} {
    %c0 = arith.constant 0 : index
    %c0_0 = arith.constant 0 : index
    %c0_1 = arith.constant 0 : index
    %0 = vector.load %arg2[%c0, %c0_0, %c0_1] : memref<1x4x512xf32, #tpu.memory_space<vmem>>, vector<1x4x512xf32>
    %1 = vector.shape_cast %0 : vector<1x4x512xf32> to vector<4x512xf32>
    %c0_2 = arith.constant 0 : index
    %c0_3 = arith.constant 0 : index
    %c0_4 = arith.constant 0 : index
    %2 = vector.load %arg3[%c0_2, %c0_3, %c0_4] : memref<1x1x512xi32, #tpu.memory_space<vmem>>, vector<1x1x512xi32>
    %3 = vector.shape_cast %2 : vector<1x1x512xi32> to vector<1x512xi32>
    %4 = tpu.iota {dimensions = array<i32: 0>} : vector<4x512xi32>
    %5 = vector.shape_cast %3 : vector<1x512xi32> to vector<1x512xi32>
    %6 = vector.broadcast %5 : vector<1x512xi32> to vector<4x512xi32>
    %c0_i32 = arith.constant 0 : i32
    %7 = vector.broadcast %c0_i32 : i32 to vector<4x512xi32>
    %8 = arith.cmpi ne, %6, %7 : vector<4x512xi32>
    %9 = arith.cmpi eq, %6, %4 : vector<4x512xi32>
    %10 = arith.andi %9, %8 : vector<4x512xi1>
    %cst = arith.constant dense<true> : vector<4x512xi1>
    %11 = arith.xori %10, %cst : vector<4x512xi1>
    %12 = arith.andi %8, %11 : vector<4x512xi1>
    %cst_5 = arith.constant 1.000000e+00 : f32
    %cst_6 = arith.constant 0.000000e+00 : f32
    %13 = vector.broadcast %cst_5 : f32 to vector<4x512xf32>
    %14 = vector.broadcast %cst_6 : f32 to vector<4x512xf32>
    %15 = arith.select %10, %13, %14 : vector<4x512xi1>, vector<4x512xf32>
    %16 = arith.subf %15, %1 : vector<4x512xf32>
    %17 = math.absf %16 : vector<4x512xf32>
    %cst_7 = arith.constant 0.000000e+00 : f32
    %18 = vector.broadcast %cst_7 : f32 to vector<4x512xf32>
    %19 = arith.select %8, %17, %18 : vector<4x512xi1>, vector<4x512xf32>
    %20 = tpu.bitcast %19 : vector<4x512xf32> -> vector<4x512xi32>
    %c-4_i32 = arith.constant -4 : i32
    %21 = vector.broadcast %c-4_i32 : i32 to vector<4x512xi32>
    %22 = arith.andi %20, %21 : vector<4x512xi32>
    %c2_i32 = arith.constant 2 : i32
    %c0_i32_8 = arith.constant 0 : i32
    %23 = vector.broadcast %c2_i32 : i32 to vector<4x512xi32>
    %24 = vector.broadcast %c0_i32_8 : i32 to vector<4x512xi32>
    %25 = arith.select %10, %23, %24 : vector<4x512xi1>, vector<4x512xi32>
    %26 = arith.ori %22, %25 : vector<4x512xi32>
    %c1_i32 = arith.constant 1 : i32
    %c0_i32_9 = arith.constant 0 : i32
    %27 = vector.broadcast %c1_i32 : i32 to vector<4x512xi32>
    %28 = vector.broadcast %c0_i32_9 : i32 to vector<4x512xi32>
    %29 = arith.select %12, %27, %28 : vector<4x512xi1>, vector<4x512xi32>
    %30 = arith.ori %26, %29 : vector<4x512xi32>
    %c0_10 = arith.constant 0 : index
    %c0_11 = arith.constant 0 : index
    %31 = vector.load %arg4[%c0_10, %c0_11] : memref<4x512xi32, #tpu.memory_space<vmem>>, vector<4x512xi32>
    tpu.vector_store %arg4[%c0_10, %c0_11], %30 {strides = array<i32>} : memref<4x512xi32, #tpu.memory_space<vmem>>, vector<4x512xi32>,
    %cst_12 = arith.constant dense<0.000000e+00> : vector<4xf32>
    %32 = vector.multi_reduction <add>, %15, %cst_12 [1] : vector<4x512xf32> to vector<4xf32>
    %33 = vector.shape_cast %32 : vector<4xf32> to vector<4x1xf32>
    %c0_13 = arith.constant 0 : index
    %c0_14 = arith.constant 0 : index
    %c0_15 = arith.constant 0 : index
    %c0_16 = arith.constant 0 : index
    %34 = vector.load %arg5[%c0_13, %c0_14, %c0_15, %c0_16] : memref<1x1x4x1xf32, #tpu.memory_space<vmem>>, vector<1x1x4x1xf32>
    %35 = vector.shape_cast %34 : vector<1x1x4x1xf32> to vector<4x1xf32>
    %36 = vector.shape_cast %33 : vector<4x1xf32> to vector<1x1x4x1xf32>
    tpu.vector_store %arg5[%c0_13, %c0_14, %c0_15, %c0_16], %36 {strides = array<i32>} : memref<1x1x4x1xf32, #tpu.memory_space<vmem>>, vector<1x1x4x1xf32>,
    return
  }
  func.func @transform_0(%arg0: i32, %arg1: i32) -> (i32, i32, i32) {
    %c0_i32 = arith.constant 0 : i32
    %c0_i32_0 = arith.constant 0 : i32
    return %arg0, %c0_i32, %arg1 : i32, i32, i32
  }
  func.func @transform_1(%arg0: i32, %arg1: i32) -> (i32, i32, i32) {
    %c0_i32 = arith.constant 0 : i32
    %c0_i32_0 = arith.constant 0 : i32
    return %arg0, %c0_i32, %arg1 : i32, i32, i32
  }
  func.func @transform_2(%arg0: i32, %arg1: i32) -> (i32, i32) {
    %c1_i32 = arith.constant 1 : i32
    %0 = arith.muli %arg0, %c1_i32 : i32
    %1 = arith.addi %0, %arg1 : i32
    %c0_i32 = arith.constant 0 : i32
    %c0_i32_0 = arith.constant 0 : i32
    return %c0_i32, %1 : i32, i32
  }
  func.func @transform_3(%arg0: i32, %arg1: i32) -> (i32, i32, i32, i32) {
    %c0_i32 = arith.constant 0 : i32
    %c0_i32_0 = arith.constant 0 : i32
    %c0_i32_1 = arith.constant 0 : i32
    return %arg0, %arg1, %c0_i32, %c0_i32_0 : i32, i32, i32, i32
  }
}

module attributes {stable_mosaic.version = 11 : i64} {
  func.func @_lovasz_scan_kernel(%arg0: i32, %arg1: memref<4x1xf32, #tpu.memory_space<vmem>>, %arg2: memref<4x512xi32, #tpu.memory_space<vmem>>, %arg3: memref<1x1xf32, #tpu.memory_space<vmem>>, %arg4: memref<256x256xf32, #tpu.memory_space<vmem>>, %arg5: memref<4x1xf32, #tpu.memory_space<vmem>>, %arg6: memref<4x1xf32, #tpu.memory_space<vmem>>, %arg7: memref<4x1xf32, #tpu.memory_space<vmem>>) attributes {dimension_semantics = [#tpu.dimension_semantics<arbitrary>], iteration_bounds = array<i64: 2>, scalar_prefetch = 0 : i64, scratch_operands = 4 : i64, tpu.core_type = #tpu.core_type<tc>, window_params = [{pipeline_mode = #tpu.pipeline_mode<synchronous>, transform_indices = @transform_0, window_bounds = array<i64: 4, 1>}, {transform_indices = @transform_1, window_bounds = array<i64: 4, 512>}, {pipeline_mode = #tpu.pipeline_mode<synchronous>, transform_indices = @transform_2, window_bounds = array<i64: 1, 1>}]} {
    %c0_i32 = arith.constant 0 : i32
    %0 = arith.cmpi eq, %arg0, %c0_i32 : i32
    %1 = arith.extui %0 : i1 to i32
    %c0_i32_0 = arith.constant 0 : i32
    %2 = arith.cmpi ne, %1, %c0_i32_0 : i32
    scf.if %2 {
      %120 = tpu.iota {dimensions = array<i32: 0>} : vector<256x256xi32>
      %121 = tpu.iota {dimensions = array<i32: 1>} : vector<256x256xi32>
      %122 = arith.cmpi sle, %120, %121 : vector<256x256xi32>
      %123 = arith.extui %122 : vector<256x256xi1> to vector<256x256xi32>
      %124 = arith.sitofp %123 : vector<256x256xi32> to vector<256x256xf32>
      %c0_47 = arith.constant 0 : index
      %c0_48 = arith.constant 0 : index
      %125 = vector.load %arg4[%c0_47, %c0_48] : memref<256x256xf32, #tpu.memory_space<vmem>>, vector<256x256xf32>
      tpu.vector_store %arg4[%c0_47, %c0_48], %124 {strides = array<i32>} : memref<256x256xf32, #tpu.memory_space<vmem>>, vector<256x256xf32>,
      %cst_49 = arith.constant 0.000000e+00 : f32
      %126 = vector.broadcast %cst_49 : f32 to vector<4x1xf32>
      %c0_50 = arith.constant 0 : index
      %c0_51 = arith.constant 0 : index
      %127 = vector.load %arg5[%c0_50, %c0_51] : memref<4x1xf32, #tpu.memory_space<vmem>>, vector<4x1xf32>
      tpu.vector_store %arg5[%c0_50, %c0_51], %126 {strides = array<i32>} : memref<4x1xf32, #tpu.memory_space<vmem>>, vector<4x1xf32>,
      %cst_52 = arith.constant 0.000000e+00 : f32
      %128 = vector.broadcast %cst_52 : f32 to vector<4x1xf32>
      %c0_53 = arith.constant 0 : index
      %c0_54 = arith.constant 0 : index
      %129 = vector.load %arg6[%c0_53, %c0_54] : memref<4x1xf32, #tpu.memory_space<vmem>>, vector<4x1xf32>
      tpu.vector_store %arg6[%c0_53, %c0_54], %128 {strides = array<i32>} : memref<4x1xf32, #tpu.memory_space<vmem>>, vector<4x1xf32>,
      %cst_55 = arith.constant 0.000000e+00 : f32
      %130 = vector.broadcast %cst_55 : f32 to vector<4x1xf32>
      %c0_56 = arith.constant 0 : index
      %c0_57 = arith.constant 0 : index
      %131 = vector.load %arg7[%c0_56, %c0_57] : memref<4x1xf32, #tpu.memory_space<vmem>>, vector<4x1xf32>
      tpu.vector_store %arg7[%c0_56, %c0_57], %130 {strides = array<i32>} : memref<4x1xf32, #tpu.memory_space<vmem>>, vector<4x1xf32>,
    } else {
    }
    %c0 = arith.constant 0 : index
    %c0_1 = arith.constant 0 : index
    %3 = vector.load %arg1[%c0, %c0_1] : memref<4x1xf32, #tpu.memory_space<vmem>>, vector<4x1xf32>
    %c0_2 = arith.constant 0 : index
    %c0_3 = arith.constant 0 : index
    %4 = vector.load %arg4[%c0_2, %c0_3] : memref<256x256xf32, #tpu.memory_space<vmem>>, vector<256x256xf32>
    %c0_4 = arith.constant 0 : index
    %c0_5 = arith.constant 0 : index
    %5 = vector.load %arg5[%c0_4, %c0_5] : memref<4x1xf32, #tpu.memory_space<vmem>>, vector<4x1xf32>
    %c0_6 = arith.constant 0 : index
    %c0_7 = arith.constant 0 : index
    %6 = vector.load %arg6[%c0_6, %c0_7] : memref<4x1xf32, #tpu.memory_space<vmem>>, vector<4x1xf32>
    %cst = arith.constant 0.000000e+00 : f32
    %7 = vector.broadcast %cst : f32 to vector<4x1xf32>
    %c0_i32_8 = arith.constant 0 : i32
    %c256_i32 = arith.constant 256 : i32
    %8 = arith.muli %c0_i32_8, %c256_i32 : i32
    %9 = tpu.assume_multiple %8, 256 : i32
    %c0_9 = arith.constant 0 : index
    %10 = arith.index_cast %9 : i32 to index
    %11 = vector.load %arg2[%c0_9, %10] : memref<4x512xi32, #tpu.memory_space<vmem>>, vector<4x256xi32>
    %c2_i32 = arith.constant 2 : i32
    %12 = vector.broadcast %c2_i32 : i32 to vector<4x256xi32>
    %13 = arith.andi %11, %12 : vector<4x256xi32>
    %c0_i32_10 = arith.constant 0 : i32
    %14 = vector.broadcast %c0_i32_10 : i32 to vector<4x256xi32>
    %15 = arith.cmpi ne, %13, %14 : vector<4x256xi32>
    %cst_11 = arith.constant 1.000000e+00 : f32
    %cst_12 = arith.constant 0.000000e+00 : f32
    %16 = vector.broadcast %cst_11 : f32 to vector<4x256xf32>
    %17 = vector.broadcast %cst_12 : f32 to vector<4x256xf32>
    %18 = arith.select %15, %16, %17 : vector<4x256xi1>, vector<4x256xf32>
    %c1_i32 = arith.constant 1 : i32
    %19 = vector.broadcast %c1_i32 : i32 to vector<4x256xi32>
    %20 = arith.andi %11, %19 : vector<4x256xi32>
    %c0_i32_13 = arith.constant 0 : i32
    %21 = vector.broadcast %c0_i32_13 : i32 to vector<4x256xi32>
    %22 = arith.cmpi ne, %20, %21 : vector<4x256xi32>
    %cst_14 = arith.constant 1.000000e+00 : f32
    %cst_15 = arith.constant 0.000000e+00 : f32
    %23 = vector.broadcast %cst_14 : f32 to vector<4x256xf32>
    %24 = vector.broadcast %cst_15 : f32 to vector<4x256xf32>
    %25 = arith.select %22, %23, %24 : vector<4x256xi1>, vector<4x256xf32>
    %c-4_i32 = arith.constant -4 : i32
    %26 = vector.broadcast %c-4_i32 : i32 to vector<4x256xi32>
    %27 = arith.andi %11, %26 : vector<4x256xi32>
    %28 = tpu.bitcast %27 : vector<4x256xi32> -> vector<4x256xf32>
    %29 = tpu.concatenate %18, %25 in 0 : vector<4x256xf32>, vector<4x256xf32> -> vector<8x256xf32>
    %cst_16 = arith.constant dense<0.000000e+00> : vector<8x256xf32>
    %30 = tpu.matmul %29, %4, %cst_16 {dimension_numbers = #tpu.dot_dimension_numbers<[1], [0], [0], [1], [0, 0, 1, 1], [], []>} : vector<8x256xf32>, vector<256x256xf32>, vector<8x256xf32> -> vector<8x256xf32>
    %31 = vector.extract_strided_slice %30 {offsets = [0, 0], sizes = [4, 256], strides = [1, 1]} : vector<8x256xf32> to vector<4x256xf32>
    %32 = vector.broadcast %5 : vector<4x1xf32> to vector<4x256xf32>
    %33 = arith.addf %32, %31 : vector<4x256xf32>
    %34 = vector.extract_strided_slice %30 {offsets = [4, 0], sizes = [4, 256], strides = [1, 1]} : vector<8x256xf32> to vector<4x256xf32>
    %35 = vector.broadcast %6 : vector<4x1xf32> to vector<4x256xf32>
    %36 = arith.addf %35, %34 : vector<4x256xf32>
    %37 = arith.subf %33, %18 : vector<4x256xf32>
    %38 = arith.subf %36, %25 : vector<4x256xf32>
    %39 = vector.broadcast %3 : vector<4x1xf32> to vector<4x256xf32>
    %40 = arith.subf %39, %37 : vector<4x256xf32>
    %41 = vector.broadcast %3 : vector<4x1xf32> to vector<4x256xf32>
    %42 = arith.addf %41, %38 : vector<4x256xf32>
    %43 = vector.broadcast %3 : vector<4x1xf32> to vector<4x256xf32>
    %44 = arith.addf %43, %36 : vector<4x256xf32>
    %45 = arith.mulf %40, %25 : vector<4x256xf32>
    %46 = arith.mulf %18, %42 : vector<4x256xf32>
    %47 = arith.addf %45, %46 : vector<4x256xf32>
    %cst_17 = arith.constant 9.99999971E-10 : f32
    %48 = vector.broadcast %cst_17 : f32 to vector<4x256xf32>
    %49 = arith.maximumf %44, %48 : vector<4x256xf32>
    %cst_18 = arith.constant 9.99999971E-10 : f32
    %50 = vector.broadcast %cst_18 : f32 to vector<4x256xf32>
    %51 = arith.maximumf %42, %50 : vector<4x256xf32>
    %52 = arith.mulf %49, %51 : vector<4x256xf32>
    %53 = arith.divf %47, %52 : vector<4x256xf32>
    %54 = arith.mulf %28, %53 : vector<4x256xf32>
    %cst_19 = arith.constant dense<0.000000e+00> : vector<4xf32>
    %55 = vector.multi_reduction <add>, %54, %cst_19 [1] : vector<4x256xf32> to vector<4xf32>
    %56 = vector.shape_cast %55 : vector<4xf32> to vector<4x1xf32>
    %57 = arith.addf %7, %56 : vector<4x1xf32>
    %58 = vector.extract_strided_slice %33 {offsets = [0, 255], sizes = [4, 1], strides = [1, 1]} : vector<4x256xf32> to vector<4x1xf32>
    %59 = vector.extract_strided_slice %36 {offsets = [0, 255], sizes = [4, 1], strides = [1, 1]} : vector<4x256xf32> to vector<4x1xf32>
    %c1_i32_20 = arith.constant 1 : i32
    %c256_i32_21 = arith.constant 256 : i32
    %60 = arith.muli %c1_i32_20, %c256_i32_21 : i32
    %61 = tpu.assume_multiple %60, 256 : i32
    %c0_22 = arith.constant 0 : index
    %62 = arith.index_cast %61 : i32 to index
    %63 = vector.load %arg2[%c0_22, %62] : memref<4x512xi32, #tpu.memory_space<vmem>>, vector<4x256xi32>
    %c2_i32_23 = arith.constant 2 : i32
    %64 = vector.broadcast %c2_i32_23 : i32 to vector<4x256xi32>
    %65 = arith.andi %63, %64 : vector<4x256xi32>
    %c0_i32_24 = arith.constant 0 : i32
    %66 = vector.broadcast %c0_i32_24 : i32 to vector<4x256xi32>
    %67 = arith.cmpi ne, %65, %66 : vector<4x256xi32>
    %cst_25 = arith.constant 1.000000e+00 : f32
    %cst_26 = arith.constant 0.000000e+00 : f32
    %68 = vector.broadcast %cst_25 : f32 to vector<4x256xf32>
    %69 = vector.broadcast %cst_26 : f32 to vector<4x256xf32>
    %70 = arith.select %67, %68, %69 : vector<4x256xi1>, vector<4x256xf32>
    %c1_i32_27 = arith.constant 1 : i32
    %71 = vector.broadcast %c1_i32_27 : i32 to vector<4x256xi32>
    %72 = arith.andi %63, %71 : vector<4x256xi32>
    %c0_i32_28 = arith.constant 0 : i32
    %73 = vector.broadcast %c0_i32_28 : i32 to vector<4x256xi32>
    %74 = arith.cmpi ne, %72, %73 : vector<4x256xi32>
    %cst_29 = arith.constant 1.000000e+00 : f32
    %cst_30 = arith.constant 0.000000e+00 : f32
    %75 = vector.broadcast %cst_29 : f32 to vector<4x256xf32>
    %76 = vector.broadcast %cst_30 : f32 to vector<4x256xf32>
    %77 = arith.select %74, %75, %76 : vector<4x256xi1>, vector<4x256xf32>
    %c-4_i32_31 = arith.constant -4 : i32
    %78 = vector.broadcast %c-4_i32_31 : i32 to vector<4x256xi32>
    %79 = arith.andi %63, %78 : vector<4x256xi32>
    %80 = tpu.bitcast %79 : vector<4x256xi32> -> vector<4x256xf32>
    %81 = tpu.concatenate %70, %77 in 0 : vector<4x256xf32>, vector<4x256xf32> -> vector<8x256xf32>
    %cst_32 = arith.constant dense<0.000000e+00> : vector<8x256xf32>
    %82 = tpu.matmul %81, %4, %cst_32 {dimension_numbers = #tpu.dot_dimension_numbers<[1], [0], [0], [1], [0, 0, 1, 1], [], []>} : vector<8x256xf32>, vector<256x256xf32>, vector<8x256xf32> -> vector<8x256xf32>
    %83 = vector.extract_strided_slice %82 {offsets = [0, 0], sizes = [4, 256], strides = [1, 1]} : vector<8x256xf32> to vector<4x256xf32>
    %84 = vector.broadcast %58 : vector<4x1xf32> to vector<4x256xf32>
    %85 = arith.addf %84, %83 : vector<4x256xf32>
    %86 = vector.extract_strided_slice %82 {offsets = [4, 0], sizes = [4, 256], strides = [1, 1]} : vector<8x256xf32> to vector<4x256xf32>
    %87 = vector.broadcast %59 : vector<4x1xf32> to vector<4x256xf32>
    %88 = arith.addf %87, %86 : vector<4x256xf32>
    %89 = arith.subf %85, %70 : vector<4x256xf32>
    %90 = arith.subf %88, %77 : vector<4x256xf32>
    %91 = vector.broadcast %3 : vector<4x1xf32> to vector<4x256xf32>
    %92 = arith.subf %91, %89 : vector<4x256xf32>
    %93 = vector.broadcast %3 : vector<4x1xf32> to vector<4x256xf32>
    %94 = arith.addf %93, %90 : vector<4x256xf32>
    %95 = vector.broadcast %3 : vector<4x1xf32> to vector<4x256xf32>
    %96 = arith.addf %95, %88 : vector<4x256xf32>
    %97 = arith.mulf %92, %77 : vector<4x256xf32>
    %98 = arith.mulf %70, %94 : vector<4x256xf32>
    %99 = arith.addf %97, %98 : vector<4x256xf32>
    %cst_33 = arith.constant 9.99999971E-10 : f32
    %100 = vector.broadcast %cst_33 : f32 to vector<4x256xf32>
    %101 = arith.maximumf %96, %100 : vector<4x256xf32>
    %cst_34 = arith.constant 9.99999971E-10 : f32
    %102 = vector.broadcast %cst_34 : f32 to vector<4x256xf32>
    %103 = arith.maximumf %94, %102 : vector<4x256xf32>
    %104 = arith.mulf %101, %103 : vector<4x256xf32>
    %105 = arith.divf %99, %104 : vector<4x256xf32>
    %106 = arith.mulf %80, %105 : vector<4x256xf32>
    %cst_35 = arith.constant dense<0.000000e+00> : vector<4xf32>
    %107 = vector.multi_reduction <add>, %106, %cst_35 [1] : vector<4x256xf32> to vector<4xf32>
    %108 = vector.shape_cast %107 : vector<4xf32> to vector<4x1xf32>
    %109 = arith.addf %57, %108 : vector<4x1xf32>
    %110 = vector.extract_strided_slice %85 {offsets = [0, 255], sizes = [4, 1], strides = [1, 1]} : vector<4x256xf32> to vector<4x1xf32>
    %111 = vector.extract_strided_slice %88 {offsets = [0, 255], sizes = [4, 1], strides = [1, 1]} : vector<4x256xf32> to vector<4x1xf32>
    %c2_i32_36 = arith.constant 2 : i32
    %c0_37 = arith.constant 0 : index
    %c0_38 = arith.constant 0 : index
    %112 = vector.load %arg5[%c0_37, %c0_38] : memref<4x1xf32, #tpu.memory_space<vmem>>, vector<4x1xf32>
    tpu.vector_store %arg5[%c0_37, %c0_38], %110 {strides = array<i32>} : memref<4x1xf32, #tpu.memory_space<vmem>>, vector<4x1xf32>,
    %c0_39 = arith.constant 0 : index
    %c0_40 = arith.constant 0 : index
    %113 = vector.load %arg6[%c0_39, %c0_40] : memref<4x1xf32, #tpu.memory_space<vmem>>, vector<4x1xf32>
    tpu.vector_store %arg6[%c0_39, %c0_40], %111 {strides = array<i32>} : memref<4x1xf32, #tpu.memory_space<vmem>>, vector<4x1xf32>,
    %c0_41 = arith.constant 0 : index
    %c0_42 = arith.constant 0 : index
    %114 = vector.load %arg7[%c0_41, %c0_42] : memref<4x1xf32, #tpu.memory_space<vmem>>, vector<4x1xf32>
    %115 = arith.addf %114, %109 : vector<4x1xf32>
    %c0_43 = arith.constant 0 : index
    %c0_44 = arith.constant 0 : index
    %116 = vector.load %arg7[%c0_43, %c0_44] : memref<4x1xf32, #tpu.memory_space<vmem>>, vector<4x1xf32>
    tpu.vector_store %arg7[%c0_43, %c0_44], %115 {strides = array<i32>} : memref<4x1xf32, #tpu.memory_space<vmem>>, vector<4x1xf32>,
    %c1_i32_45 = arith.constant 1 : i32
    %117 = arith.cmpi eq, %arg0, %c1_i32_45 : i32
    %118 = arith.extui %117 : i1 to i32
    %c0_i32_46 = arith.constant 0 : i32
    %119 = arith.cmpi ne, %118, %c0_i32_46 : i32
    scf.if %119 {
      %cst_47 = arith.constant 0.000000e+00 : f32
      %120 = vector.broadcast %cst_47 : f32 to vector<4x1xf32>
      %121 = arith.cmpf ogt, %3, %120 : vector<4x1xf32>
      %cst_48 = arith.constant 1.000000e+00 : f32
      %cst_49 = arith.constant 0.000000e+00 : f32
      %122 = vector.broadcast %cst_48 : f32 to vector<4x1xf32>
      %123 = vector.broadcast %cst_49 : f32 to vector<4x1xf32>
      %124 = arith.select %121, %122, %123 : vector<4x1xi1>, vector<4x1xf32>
      %c0_50 = arith.constant 0 : index
      %c0_51 = arith.constant 0 : index
      %125 = vector.load %arg7[%c0_50, %c0_51] : memref<4x1xf32, #tpu.memory_space<vmem>>, vector<4x1xf32>
      %126 = arith.mulf %125, %124 : vector<4x1xf32>
      %127 = vector.shape_cast %126 : vector<4x1xf32> to vector<1x4x1xf32>
      %cst_52 = arith.constant dense<0.000000e+00> : vector<1xf32>
      %128 = vector.multi_reduction <add>, %127, %cst_52 [1, 2] : vector<1x4x1xf32> to vector<1xf32>
      %129 = vector.shape_cast %128 : vector<1xf32> to vector<1x1x1xf32>
      %130 = vector.extract %129[0, 0, 0] : f32 from vector<1x1x1xf32>
      %131 = vector.broadcast %130 : f32 to vector<1x1xf32>
      %132 = vector.shape_cast %124 : vector<4x1xf32> to vector<1x4x1xf32>
      %cst_53 = arith.constant dense<0.000000e+00> : vector<1xf32>
      %133 = vector.multi_reduction <add>, %132, %cst_53 [1, 2] : vector<1x4x1xf32> to vector<1xf32>
      %134 = vector.shape_cast %133 : vector<1xf32> to vector<1x1x1xf32>
      %135 = vector.extract %134[0, 0, 0] : f32 from vector<1x1x1xf32>
      %136 = vector.broadcast %135 : f32 to vector<1x1xf32>
      %cst_54 = arith.constant 1.000000e+00 : f32
      %137 = vector.broadcast %cst_54 : f32 to vector<1x1xf32>
      %138 = arith.maximumf %136, %137 : vector<1x1xf32>
      %139 = arith.divf %131, %138 : vector<1x1xf32>
      %c0_55 = arith.constant 0 : index
      %c0_56 = arith.constant 0 : index
      %140 = vector.load %arg3[%c0_55, %c0_56] : memref<1x1xf32, #tpu.memory_space<vmem>>, vector<1x1xf32>
      tpu.vector_store %arg3[%c0_55, %c0_56], %139 {strides = array<i32>} : memref<1x1xf32, #tpu.memory_space<vmem>>, vector<1x1xf32>,
    } else {
    }
    return
  }
  func.func @transform_0(%arg0: i32) -> (i32, i32) {
    %c0_i32 = arith.constant 0 : i32
    %c0_i32_0 = arith.constant 0 : i32
    %c0_i32_1 = arith.constant 0 : i32
    return %c0_i32, %c0_i32_0 : i32, i32
  }
  func.func @transform_1(%arg0: i32) -> (i32, i32) {
    %c0_i32 = arith.constant 0 : i32
    %c0_i32_0 = arith.constant 0 : i32
    return %c0_i32, %arg0 : i32, i32
  }
  func.func @transform_2(%arg0: i32) -> (i32, i32) {
    %c0_i32 = arith.constant 0 : i32
    %c0_i32_0 = arith.constant 0 : i32
    %c0_i32_1 = arith.constant 0 : i32
    return %c0_i32, %c0_i32_0 : i32, i32
  }
}

</mosaic_0001>

<bundles_post_ra>
// kernel: _lovasz_single.2
= control target key start
LH: loop header
LB: loop body
LE: loop exit
PB: predicated region body
PF: predicated region fallthrough
CT: control target
= control target key end

     0   :  { %s575_s12 = smov 0   ;;  %s577_s13 = smov 0   ;;  %s751_s0 = inlined_call_operand.vmem [shape: f32[2,4,512], index: 0, kind: input, shape index: {}]   ;;  %s752_s1 = inlined_call_operand.vmem [shape: s32[2,1,512], index: 1, kind: input, shape index: {}]   ;;  %s753_s2 = inlined_call_operand.vmem [shape: u32[4,1024], index: 2, kind: output, shape index: {0}]   ;;  %s754_s3 = inlined_call_operand.vmem [shape: f32[2,1,4,1], index: 3, kind: output, shape index: {1}]  }
   0x1   :  { %s579_s14 = smov 0  }
   0x2 LB: > { %s26_s15 = sadd.s32 1, %s546_s13  ;;  %p491_p0 = scmp.ge.s32.totalorder %s550_s14, 1  ;;  %s550_s14 = sphi %s579_s14, %s14_s14   ;;  %s546_s13 = sphi %s577_s13, %s781_s13   ;;  %s542_s12 = sphi %s575_s12, %s780_s12  }
   0x3   : > { %p28_p1 = scmp.ge.s32.totalorder %s26_s15, 2  ;;  %p179_p2 = scmp.lt.s32.totalorder %s550_s14, 3 }
   0x5   : > { %s783_s15 = smov (%p28_p1, %s26_s15), 0  ;;  %p180_p3 = pnand %p491_p0, %p179_p2 }
   0x6   : > { %p224_p4 = scmp.lt.s32.totalorder (!%p180_p3), %s542_s12, 1  ;;  %s495_s25 = sshll.u32 (!%p180_p3), %s542_s12, 2 }
   0x7   : > { %183 = sbr.rel (%p180_p3) target bundleno = 148 (0x94), region = 28  ;;  %p660_p5 = scmp.lt.s32.totalorder (!%p180_p3), %s495_s25, 7 }
   0xc   : > { %s597_s16 = scalar_select %p224_p4, %s542_s12, 1  ;;  %v260_v0 = vlaneseq  ;;  %vm341_vm2 = vcmask 1043456   ;;  %v552_v15 = vmov 0.0   ;;  %vm553_vm13 = vmmov 1  }
   0xd   : > { %v554_v28 = vmov 0   ;;  %s785_s25 = smov (!%p660_p5, %s495_s25), 7 }
   0xe   : > { %s500_s17 = sshll.u32 %s597_s16, 4  ;;  %s494_s18 = sshll.u32 %s597_s16, 2  ;;  %v261_v4 = vshrl.u32 %v260_v0, 7 }
   0xf   : > { %s231_s21 = scalar_lea.vmem %s751_s0, %s500_s17  ;;  %s240_s24 = scalar_lea.vmem %s752_s1, %s494_s18 }
  0x10   : > { %v257_v1 = vld [vmem:[%s231_s21] sm:$0xff]  ;;  %v258_v2 = vld [vmem:[%s231_s21 + $0x8] sm:$0xff]  ;;  %s496_s27 = sshll.u32 %s785_s25, 2  ;;  %s256_s6 = scalar_lea.vmem %s754_s3, %s494_s18 }
  0x11   : > { %v259_v3 = vld [vmem:[%s240_s24] sm:$0xf]  ;;  %292 = vst [vmem:[#allocation1] ss:$2 sm:$0xff] %v257_v1  ;;  %s247_s30 = scalar_lea.vmem %s753_s2, %s496_s27 }
  0x12   : > { %v262_v5 = vperm.slane %v259_v3, 0  ;;  %v263_v6 = vperm.slane %v259_v3, 1  ;;  %v264_v7 = vperm.slane %v259_v3, 2  ;;  %v265_v8 = vperm.slane %v259_v3, 3  ;;  %294 = vst [vmem:[#allocation1 + $0x10] ss:$2 sm:$0xff] %v258_v2 }
  0x14   : > { %vm609_vm0 = vcmp.ne.s32.totalorder %v262_v5, 0  ;;  %vm613_vm1 = vcmp.ne.s32.totalorder %v263_v6, 0  ;;  %vm617_vm3 = vcmp.ne.s32.totalorder %v264_v7, 0  ;;  %vm270_vm4 = vcmp.eq.s32.totalorder %v262_v5, %v261_v4 }
  0x15   : > { %vm271_vm5 = vcmp.eq.s32.totalorder %v263_v6, %v261_v4  ;;  %vm272_vm6 = vcmp.eq.s32.totalorder %v264_v7, %v261_v4  ;;  %vm621_vm7 = vcmp.ne.s32.totalorder %v265_v8, 0  ;;  %vm273_vm8 = vcmp.eq.s32.totalorder %v265_v8, %v261_v4  ;;  %vm627_vm9 = vmand %vm270_vm4, %vm609_vm0 }
  0x16   : > { %vm634_vm10 = vmand %vm271_vm5, %vm613_vm1  ;;  %v286_v16 = vsel %vm627_vm9, 1.0, %v552_v15  ;;  %v323_v29 = vsel %vm627_vm9, 2, %v554_v28 }
  0x17   : > { %vm642_vm11 = vmand %vm272_vm6, %vm617_vm3  ;;  %v287_v18 = vsel %vm634_vm10, 1.0, %v552_v15  ;;  %v346_v19 = vsel %vm341_vm2, %v286_v16, 0.0  ;;  %v324_v42 = vsel %vm634_vm10, 2, %v554_v28 }
  0x18   : > { %vm651_vm12 = vmand %vm273_vm8, %vm621_vm7  ;;  %v288_v21 = vsel %vm642_vm11, 1.0, %v552_v15  ;;  %v295_v22 = vld.sshfl [vmem:[#allocation1] sm:$0xff pattern:$0x75316420]  ;;  %v347_v23 = vsel %vm341_vm2, %v287_v18, 0.0  ;;  %v325_v48 = vsel %vm642_vm11, 2, %v554_v28 }
  0x19   : > { %vm667_vm14 = vmxor %vm627_vm9, %vm553_vm13  ;;  %v289_v25 = vsel %vm651_vm12, 1.0, %v552_v15  ;;  %v296_v26 = vld.sshfl [vmem:[#allocation1 + $0x8] sm:$0xff pattern:$0x75316420]  ;;  %v303_v27 = vsub.f32 %v286_v16, %v295_v22  ;;  %v348_v30 = vadd.f32 %v347_v23, %v346_v19  ;;  %v349_v39 = vsel %vm341_vm2, %v288_v21, 0.0 }
  0x1a   : > { %vm678_vm15 = vmxor %vm634_vm10, %vm553_vm13  ;;  %v297_v32 = vld.sshfl [vmem:[#allocation1 + $0x10] sm:$0xff pattern:$0x75316420]  ;;  %v298_v33 = vld.sshfl [vmem:[#allocation1 + $0x18] sm:$0xff pattern:$0x75316420]  ;;  %v304_v34 = vsub.f32 %v287_v18, %v296_v26 }
  0x1b   : > { %vm685_vm4 = vmxor %vm642_vm11, %vm553_vm13  ;;  %v305_v36 = vsub.f32 %v288_v21, %v297_v32  ;;  %v306_v37 = vsub.f32 %v289_v25, %v298_v33  ;;  %v307_v38 = vand.u32 2147483647, %v303_v27  ;;  %v350_v43 = vadd.f32 %v349_v39, %v348_v30 }
  0x1c   : > { %vm693_vm5 = vmxor %vm651_vm12, %vm553_vm13  ;;  %v308_v41 = vand.u32 2147483647, %v304_v34  ;;  %v351_v44 = vsel %vm341_vm2, %v289_v25, 0.0  ;;  %v326_v51 = vsel %vm651_vm12, 2, %v554_v28 }
  0x1d   : > { %vm282_vm6 = vmand %vm609_vm0, %vm667_vm14  ;;  %v309_v45 = vand.u32 2147483647, %v305_v36  ;;  %v310_v46 = vand.u32 2147483647, %v306_v37  ;;  %v311_v47 = vsel %vm609_vm0, %v307_v38, 0.0  ;;  %v352_v52 = vadd.f32 %v351_v44, %v350_v43 }
  0x1e   : > { %vm283_vm8 = vmand %vm613_vm1, %vm678_vm15  ;;  %v312_v49 = vsel %vm613_vm1, %v308_v41, 0.0  ;;  %v319_v50 = vand.u32 4294967292, %v311_v47  ;;  %v331_v56 = vsel %vm282_vm6, 1, %v554_v28 }
  0x1f   : > { %vm284_vm0 = vmand %vm617_vm3, %vm685_vm4  ;;  %v313_v53 = vsel %vm617_vm3, %v309_v45, 0.0  ;;  %v314_v54 = vsel %vm621_vm7, %v310_v46, 0.0  ;;  %v320_v55 = vand.u32 4294967292, %v312_v49  ;;  %v332_v60 = vsel %vm283_vm8, 1, %v554_v28  ;;  %353 = vadd.xlane.f32.xlu0 %v352_v52 }
  0x20   : > { %vm285_vm1 = vmand %vm621_vm7, %vm693_vm5  ;;  %v321_v57 = vand.u32 4294967292, %v313_v53  ;;  %v322_v58 = vand.u32 4294967292, %v314_v54  ;;  %v327_v59 = vor.u32 %v323_v29, %v319_v50  ;;  %v333_v62 = vsel %vm284_vm0, 1, %v554_v28 }
  0x21   : > { %v328_v61 = vor.u32 %v324_v42, %v320_v55  ;;  %v334_v63 = vsel %vm285_vm1, 1, %v554_v28  ;;  %vm355_vm3 = vcmask 3072  }
  0x22   : > { %v329_v0 = vor.u32 %v325_v48, %v321_v57  ;;  %v330_v1 = vor.u32 %v326_v51, %v322_v58  ;;  %v335_v2 = vor.u32 %v331_v56, %v327_v59 }
  0x23   : > { %v336_v3 = vor.u32 %v332_v60, %v328_v61 }
  0x24   : > { %v337_v4 = vor.u32 %v333_v62, %v329_v0  ;;  %v338_v5 = vor.u32 %v334_v63, %v330_v1 }
  0x25   : > { %v339_v6 = vrot.slane %v336_v3, 4 }
  0x26   : > { %v340_v7 = vrot.slane %v338_v5, 4 }
  0x27   : > { %v342_v8 = vsel %vm341_vm2, %v335_v2, %v339_v6 }
  0x28   : > { %v343_v9 = vsel %vm341_vm2, %v337_v4, %v340_v7  ;;  %344 = vst [vmem:[%s247_s30] sm:$0xff] %v342_v8 }
  0x29   : > { %345 = vst [vmem:[%s247_s30 + $0x8] sm:$0xff] %v343_v9 }
  0x92   : > { %v354_v10 = vpop.xlane.xlu0 %353 }
  0x93   : > { %356 = vst.msk [vmem:[%s256_s6] sm:$0xf] %vm355_vm3, %v354_v10 }
  0x94 PF: > { %s14_s14 = sadd.s32 1, %s550_s14   ;;  %s780_s12 = smov %s546_s13 }
  0x95   : > { %p11_p6 = scmp.ge.s32.totalorder %s14_s14, 4   ;;  %s781_s13 = smov %s783_s15 }
  0x97   :  { %13 = sbr.rel (!%p11_p6) target bundleno = 2 (0x2), region = 74 }

// kernel: _lovasz_single.3
= control target key start
LH: loop header
LB: loop body
LE: loop exit
PB: predicated region body
PF: predicated region fallthrough
CT: control target
= control target key end

     0   :  { %7 = vsyncpa [#allocation7], 0  ;;  %s1191_s9 = smov 0   ;;  %s1675_s0 = inlined_call_operand.vmem [shape: f32[4,1], index: 0, kind: input, shape index: {}]   ;;  %s1676_s1 = inlined_call_operand.vmem [shape: u32[4,1024], index: 1, kind: input, shape index: {}]   ;;  %s1677_s2 = inlined_call_operand.hbm [shape: f32[1,1], index: 2, kind: output, shape index: {}]  }
   0x1 LB: > { %s1197_s10 = sadd.s32 4294967295, %s1166_s9   ;;  %p1045_p0 = scmp.ge.s32.totalorder %s1166_s9, 1  ;;  %s1166_s9 = sphi %s1191_s9, %s13_s9  }
   0x2   : > { %p109_p1 = scmp.lt.s32.totalorder %s1166_s9, 3 }
   0x4   : > { %p110_p2 = pnand %p1045_p0, %p109_p1 }
   0x6   : > { %113 = sbr.rel (%p110_p2) target bundleno = 833 (0x341), region = 28 }
   0xb   : > { %s1046_s11 = sshll.u32 %s1197_s10, 2  ;;  %p1048_p4 = scmp.ne.s32.totalorder %s1197_s10, 0 }
   0xc   : > { %p127_p3 = scmp.lt.s32.totalorder %s1046_s11, 7 }
   0xd   : > { %135 = sbr.rel (%p1048_p4) target bundleno = 86 (0x56), region = 32 }
   0xe   : > { %s1710_s11 = smov (!%p127_p3, %s1046_s11), 7 }
   0xf   : > { %s1047_s12 = sshll.u32 %s1710_s11, 2 }
  0x10   : > { %s1205_s15 = scalar_lea.vmem %s1676_s1, %s1047_s12 }
  0x12   : > { %v136_v0 = vlaneseq  ;;  %v1168_v1 = vmov 0.0   ;;  %v1169_v5 = vmov 1.0  }
  0x13   : > { %396 = vst [vmem:[#allocation2 + $0x148] sm:$0xff] %v1168_v1 }
  0x14   : > { %v1209_v2 = vshrl.u32 %v136_v0, 7  ;;  %v1211_v3 = vand.u32 127, %v136_v0  ;;  %398 = vst [vmem:[#allocation2 + $0x100] sm:$0xff] %v1168_v1 }
  0x15   : > { %400 = vst [vmem:[#allocation2 + $0x40] sm:$0xff] %v1168_v1 }
  0x16   : > { %vm172_vm0 = vcmp.le.s32.totalorder %v1209_v2, %v1211_v3  ;;  %402 = vst [vmem:[#allocation2 + $0x20] sm:$0xff] %v1168_v1  ;;  %v138_v6 = vadd.s32 8, %v1209_v2  ;;  %v139_v7 = vadd.s32 16, %v1209_v2  ;;  %v140_v8 = vadd.s32 24, %v1209_v2 }
  0x17   : > { %v1049_v4 = vsel %vm172_vm0, 1.0, %v1168_v1  ;;  %404 = vst [vmem:[#allocation2 + $0x1a0] sm:$0xff] %v1168_v1  ;;  %v141_v9 = vadd.s32 32, %v1209_v2  ;;  %v142_v10 = vadd.s32 40, %v1209_v2  ;;  %v143_v11 = vadd.s32 48, %v1209_v2 }
  0x18   : > { %364 = vst [vmem:[#allocation2 + $0xb0] sm:$0xff] %v1049_v4  ;;  %vm174_vm1 = vcmp.le.s32.totalorder %v138_v6, %v1211_v3  ;;  %vm176_vm2 = vcmp.le.s32.totalorder %v139_v7, %v1211_v3  ;;  %vm178_vm3 = vcmp.le.s32.totalorder %v140_v8, %v1211_v3  ;;  %v144_v12 = vadd.s32 56, %v1209_v2 }
  0x19   : > { %406 = vst [vmem:[#allocation2 + $0xe8] sm:$0xff] %v1168_v1  ;;  %v1050_v13 = vsel %vm174_vm1, 1.0, %v1168_v1  ;;  %vm180_vm4 = vcmp.le.s32.totalorder %v141_v9, %v1211_v3  ;;  %v145_v14 = vadd.s32 64, %v1209_v2  ;;  %v1051_v15 = vsel %vm176_vm2, 1.0, %v1168_v1 }
  0x1a   : > { %408 = vst [vmem:[#allocation2 + $0x70] sm:$0xff] %v1168_v1  ;;  %vm182_vm5 = vcmp.le.s32.totalorder %v142_v10, %v1211_v3  ;;  %v146_v16 = vadd.s32 72, %v1209_v2  ;;  %v1052_v17 = vsel %vm178_vm3, 1.0, %v1168_v1  ;;  %vm184_vm6 = vcmp.le.s32.totalorder %v143_v11, %v1211_v3 }
  0x1b   : > { %410 = vst [vmem:[#allocation2 + $0x1d8] sm:$0xff] %v1168_v1  ;;  %v147_v18 = vadd.s32 80, %v1209_v2  ;;  %v1053_v19 = vsel %vm180_vm4, 1.0, %v1168_v1  ;;  %vm186_vm7 = vcmp.le.s32.totalorder %v144_v12, %v1211_v3  ;;  %v148_v20 = vadd.s32 88, %v1209_v2 }
  0x1c   : > { %412 = vst [vmem:[#allocation2 + $0xb8] sm:$0xff] %v1168_v1  ;;  %v1054_v21 = vsel %vm182_vm5, 1.0, %v1168_v1  ;;  %vm188_vm8 = vcmp.le.s32.totalorder %v145_v14, %v1211_v3  ;;  %v149_v22 = vadd.s32 96, %v1209_v2  ;;  %v1055_v23 = vsel %vm184_vm6, 1.0, %v1168_v1 }
  0x1d   : > { %414 = vst [vmem:[#allocation2 + $0xa8] sm:$0xff] %v1168_v1  ;;  %vm190_vm9 = vcmp.le.s32.totalorder %v146_v16, %v1211_v3  ;;  %v150_v24 = vadd.s32 104, %v1209_v2  ;;  %v1056_v25 = vsel %vm186_vm7, 1.0, %v1168_v1  ;;  %vm192_vm10 = vcmp.le.s32.totalorder %v147_v18, %v1211_v3 }
  0x1e   : > { %416 = vst [vmem:[#allocation2 + $0x170] sm:$0xff] %v1168_v1  ;;  %v151_v26 = vadd.s32 112, %v1209_v2  ;;  %v1057_v27 = vsel %vm188_vm8, 1.0, %v1168_v1  ;;  %vm194_vm11 = vcmp.le.s32.totalorder %v148_v20, %v1211_v3  ;;  %v152_v28 = vadd.s32 120, %v1209_v2 }
  0x1f   : > { %418 = vst [vmem:[#allocation2 + $0x68] sm:$0xff] %v1168_v1  ;;  %v1058_v29 = vsel %vm190_vm9, 1.0, %v1168_v1  ;;  %vm196_vm12 = vcmp.le.s32.totalorder %v149_v22, %v1211_v3  ;;  %v153_v30 = vadd.s32 128, %v1209_v2  ;;  %v1269_v31 = vadd.s32 128, %v1211_v3 }
  0x20   : > { %420 = vst [vmem:[#allocation2 + $0x198] sm:$0xff] %v1168_v1  ;;  %v1059_v32 = vsel %vm192_vm10, 1.0, %v1168_v1  ;;  %vm198_vm13 = vcmp.le.s32.totalorder %v150_v24, %v1211_v3  ;;  %v154_v33 = vadd.s32 136, %v1209_v2  ;;  %v1060_v34 = vsel %vm194_vm11, 1.0, %v1168_v1 }
  0x21   : > { %422 = vst [vmem:[#allocation2 + $0xc0] sm:$0xff] %v1168_v1  ;;  %vm200_vm14 = vcmp.le.s32.totalorder %v151_v26, %v1211_v3  ;;  %v155_v35 = vadd.s32 144, %v1209_v2  ;;  %v1061_v36 = vsel %vm196_vm12, 1.0, %v1168_v1  ;;  %vm202_vm15 = vcmp.le.s32.totalorder %v152_v28, %v1211_v3 }
  0x22   : > { %424 = vst [vmem:[#allocation2 + $0x158] sm:$0xff] %v1168_v1  ;;  %v156_v37 = vadd.s32 152, %v1209_v2  ;;  %v1062_v38 = vsel %vm198_vm13, 1.0, %v1168_v1  ;;  %vm205_vm0 = vcmp.le.s32.totalorder %v153_v30, %v1269_v31  ;;  %v157_v39 = vadd.s32 160, %v1209_v2 }
  0x23   : > { %426 = vst [vmem:[#allocation2 + $0x58] sm:$0xff] %v1168_v1  ;;  %v1063_v40 = vsel %vm200_vm14, 1.0, %v1168_v1  ;;  %vm207_vm1 = vcmp.le.s32.totalorder %v154_v33, %v1269_v31  ;;  %v158_v41 = vadd.s32 168, %v1209_v2  ;;  %v1064_v42 = vsel %vm202_vm15, 1.0, %v1168_v1 }
  0x24   : > { %365 = vst [vmem:[#allocation2 + $0x1b0] sm:$0xff] %v1169_v5  ;;  %vm209_vm2 = vcmp.le.s32.totalorder %v155_v35, %v1269_v31  ;;  %v159_v43 = vadd.s32 176, %v1209_v2  ;;  %v1065_v44 = vsel %vm205_vm0, 1.0, %v1168_v1  ;;  %vm211_vm3 = vcmp.le.s32.totalorder %v156_v37, %v1269_v31 }
  0x25   : > { %367 = vst [vmem:[#allocation2 + $0x18] sm:$0xff] %v1169_v5  ;;  %v160_v45 = vadd.s32 184, %v1209_v2  ;;  %v1066_v46 = vsel %vm207_vm1, 1.0, %v1168_v1  ;;  %vm213_vm4 = vcmp.le.s32.totalorder %v157_v39, %v1269_v31  ;;  %v161_v47 = vadd.s32 192, %v1209_v2 }
  0x26   : > { %369 = vst [vmem:[#allocation2 + $0x168] sm:$0xff] %v1169_v5  ;;  %v1067_v48 = vsel %vm209_vm2, 1.0, %v1168_v1  ;;  %vm215_vm5 = vcmp.le.s32.totalorder %v158_v41, %v1269_v31  ;;  %v162_v49 = vadd.s32 200, %v1209_v2  ;;  %v1068_v50 = vsel %vm211_vm3, 1.0, %v1168_v1 }
  0x27   : > { %371 = vst [vmem:[#allocation2 + $0x48] sm:$0xff] %v1169_v5  ;;  %vm217_vm6 = vcmp.le.s32.totalorder %v159_v43, %v1269_v31  ;;  %v163_v51 = vadd.s32 208, %v1209_v2  ;;  %v1069_v52 = vsel %vm213_vm4, 1.0, %v1168_v1  ;;  %vm219_vm7 = vcmp.le.s32.totalorder %v160_v45, %v1269_v31 }
  0x28   : > { %373 = vst [vmem:[#allocation2 + $0x110] sm:$0xff] %v1169_v5  ;;  %v164_v53 = vadd.s32 216, %v1209_v2  ;;  %v1070_v54 = vsel %vm215_vm5, 1.0, %v1168_v1  ;;  %vm221_vm8 = vcmp.le.s32.totalorder %v161_v47, %v1269_v31  ;;  %v165_v55 = vadd.s32 224, %v1209_v2 }
  0x29   : > { %375 = vst [vmem:[#allocation2 + $0x98] sm:$0xff] %v1169_v5  ;;  %v1071_v56 = vsel %vm217_vm6, 1.0, %v1168_v1  ;;  %vm223_vm9 = vcmp.le.s32.totalorder %v162_v49, %v1269_v31  ;;  %v166_v57 = vadd.s32 232, %v1209_v2  ;;  %v1072_v58 = vsel %vm219_vm7, 1.0, %v1168_v1 }
  0x2a   : > { %377 = vst [vmem:[#allocation2 + $0x150] sm:$0xff] %v1169_v5  ;;  %vm225_vm10 = vcmp.le.s32.totalorder %v163_v51, %v1269_v31  ;;  %v167_v59 = vadd.s32 240, %v1209_v2  ;;  %v1073_v60 = vsel %vm221_vm8, 1.0, %v1168_v1  ;;  %vm227_vm11 = vcmp.le.s32.totalorder %v164_v53, %v1269_v31 }
  0x2b   : > { %379 = vst [vmem:[#allocation2 + $0x60] sm:$0xff] %v1169_v5  ;;  %v168_v61 = vadd.s32 248, %v1209_v2  ;;  %v1074_v62 = vsel %vm223_vm9, 1.0, %v1168_v1  ;;  %vm229_vm12 = vcmp.le.s32.totalorder %v165_v55, %v1269_v31  ;;  %v1075_v63 = vsel %vm225_vm10, 1.0, %v1168_v1 }
  0x2c   : > { %381 = vst [vmem:[#allocation2 + $0x188] sm:$0xff] %v1169_v5  ;;  %vm231_vm13 = vcmp.le.s32.totalorder %v166_v57, %v1269_v31  ;;  %v1076_v0 = vsel %vm227_vm11, 1.0, %v1168_v1  ;;  %vm233_vm14 = vcmp.le.s32.totalorder %v167_v59, %v1269_v31  ;;  %v1077_v3 = vsel %vm229_vm12, 1.0, %v1168_v1 }
  0x2d   : > { %383 = vst [vmem:[#allocation2 + $0x140] sm:$0xff] %v1169_v5  ;;  %vm235_vm15 = vcmp.le.s32.totalorder %v168_v61, %v1269_v31  ;;  %v1078_v2 = vsel %vm231_vm13, 1.0, %v1168_v1  ;;  %v1079_v4 = vsel %vm233_vm14, 1.0, %v1168_v1  ;;  %vm428_vm0 = vcmask 3072  }
  0x2e   : > { %385 = vst [vmem:[#allocation2 + $0x1a8] sm:$0xff] %v1169_v5 }
  0x2f   : > { %387 = vst [vmem:[#allocation2 + $0x28] sm:$0xff] %v1169_v5 }
  0x30   : > { %389 = vst [vmem:[#allocation2 + $0xf8] sm:$0xff] %v1169_v5 }
  0x31   : > { %391 = vst [vmem:[#allocation2 + $0x30] sm:$0xff] %v1169_v5 }
  0x32   : > { %393 = vst [vmem:[#allocation2] sm:$0xff] %v1169_v5 }
  0x33   : > { %395 = vst [vmem:[#allocation2 + $0x8] sm:$0xff] %v1169_v5  ;;  %v1080_v5 = vsel %vm235_vm15, 1.0, %v1168_v1 }
  0x34   : > { %366 = vst [vmem:[#allocation2 + $0xd8] sm:$0xff] %v1050_v13 }
  0x35   : > { %368 = vst [vmem:[#allocation2 + $0x50] sm:$0xff] %v1051_v15 }
  0x36   : > { %370 = vst [vmem:[#allocation2 + $0x130] sm:$0xff] %v1052_v17 }
  0x37   : > { %372 = vst [vmem:[#allocation2 + $0x180] sm:$0xff] %v1053_v19 }
  0x38   : > { %374 = vst [vmem:[#allocation2 + $0x118] sm:$0xff] %v1054_v21 }
  0x39   : > { %376 = vst [vmem:[#allocation2 + $0x120] sm:$0xff] %v1055_v23 }
  0x3a   : > { %378 = vst [vmem:[#allocation2 + $0x108] sm:$0xff] %v1056_v25 }
  0x3b   : > { %380 = vst [vmem:[#allocation2 + $0xe0] sm:$0xff] %v1057_v27 }
  0x3c   : > { %382 = vst [vmem:[#allocation2 + $0x138] sm:$0xff] %v1058_v29 }
  0x3d   : > { %384 = vst [vmem:[#allocation2 + $0x80] sm:$0xff] %v1059_v32 }
  0x3e   : > { %386 = vst [vmem:[#allocation2 + $0x1b8] sm:$0xff] %v1060_v34 }
  0x3f   : > { %388 = vst [vmem:[#allocation2 + $0x1e8] sm:$0xff] %v1061_v36 }
  0x40   : > { %390 = vst [vmem:[#allocation2 + $0x160] sm:$0xff] %v1062_v38 }
  0x41   : > { %392 = vst [vmem:[#allocation2 + $0x1e0] sm:$0xff] %v1063_v40 }
  0x42   : > { %394 = vst [vmem:[#allocation2 + $0xf0] sm:$0xff] %v1064_v42 }
  0x43   : > { %397 = vst [vmem:[#allocation2 + $0x1d0] sm:$0xff] %v1065_v44 }
  0x44   : > { %399 = vst [vmem:[#allocation2 + $0xc8] sm:$0xff] %v1066_v46 }
  0x45   : > { %401 = vst [vmem:[#allocation2 + $0x1f8] sm:$0xff] %v1067_v48 }
  0x46   : > { %403 = vst [vmem:[#allocation2 + $0x128] sm:$0xff] %v1068_v50 }
  0x47   : > { %405 = vst [vmem:[#allocation2 + $0x1f0] sm:$0xff] %v1069_v52 }
  0x48   : > { %407 = vst [vmem:[#allocation2 + $0x78] sm:$0xff] %v1070_v54 }
  0x49   : > { %409 = vst [vmem:[#allocation2 + $0x90] sm:$0xff] %v1071_v56 }
  0x4a   : > { %411 = vst [vmem:[#allocation2 + $0xd0] sm:$0xff] %v1072_v58 }
  0x4b   : > { %413 = vst [vmem:[#allocation2 + $0x88] sm:$0xff] %v1073_v60 }
  0x4c   : > { %415 = vst [vmem:[#allocation2 + $0x1c8] sm:$0xff] %v1074_v62 }
  0x4d   : > { %417 = vst [vmem:[#allocation2 + $0x178] sm:$0xff] %v1075_v63 }
  0x4e   : > { %419 = vst [vmem:[#allocation2 + $0x190] sm:$0xff] %v1076_v0 }
  0x4f   : > { %421 = vst [vmem:[#allocation2 + $0x38] sm:$0xff] %v1077_v3 }
  0x50   : > { %423 = vst [vmem:[#allocation2 + $0x1c0] sm:$0xff] %v1078_v2 }
  0x51   : > { %425 = vst [vmem:[#allocation2 + $0x10] sm:$0xff] %v1079_v4 }
  0x52   : > { %427 = vst [vmem:[#allocation2 + $0xa0] sm:$0xff] %v1080_v5 }
  0x53   : > { %429 = vst.msk [vmem:[#allocation3] sm:$0xf] %vm428_vm0, %v1168_v1 }
  0x54   : > { %430 = vst.msk [vmem:[#allocation4] sm:$0xf] %vm428_vm0, %v1168_v1 }
  0x55   : > { %431 = vst.msk [vmem:[#allocation5] sm:$0xf] %vm428_vm0, %v1168_v1 }
  0x56 PF: > { %v1330_v6 = vld [vmem:[#allocation2 + $0xf0] sm:$0xff]  ;;  %v1332_v7 = vld [vmem:[#allocation2 + $0x58] sm:$0xff]  ;;  %v1334_v8 = vld [vmem:[#allocation2 + $0x8] sm:$0xff]  ;;  %vm525_vm3 = vcmask 1043456   ;;  %s1173_s18 = smov 1   ;;  %p1082_p5 = scmp.ne.s32.totalorder %s1197_s10, 1 }
  0x57   : > { %528 = vmatpush.msra.mxu0 %v1330_v6  ;;  %548 = vmatpush.msra.mxu1 %v1332_v7  ;;  %v1340_v10 = vld [vmem:[#allocation2 + $0x1e0] sm:$0xff]  ;;  %v1342_v11 = vld [vmem:[#allocation2 + $0x158] sm:$0xff]  ;;  %v1356_v15 = vld [vmem:[#allocation2 + $0x30] sm:$0xff] }
  0x58   : > { %568 = vmatpush.msra.mxu2 %v1334_v8  ;;  %v1346_v1 = vld [vmem:[#allocation2] sm:$0xff]  ;;  %v1348_v12 = vld [vmem:[#allocation2 + $0x10] sm:$0xff]  ;;  %v1362_v17 = vld [vmem:[#allocation2 + $0x1e8] sm:$0xff] }
  0x59   : > { %v1338_v9 = vld [vmem:[#allocation2 + $0xa0] sm:$0xff]  ;;  %529 = vmatpush.msra.mxu0 %v1340_v10  ;;  %549 = vmatpush.msra.mxu1 %v1342_v11  ;;  %v1364_v18 = vld [vmem:[#allocation2 + $0x198] sm:$0xff]  ;;  %v1376_v22 = vld [vmem:[#allocation2 + $0x68] sm:$0xff] }
  0x5a   : > { %588 = vmatpush.msra.mxu3 %v1338_v9  ;;  %v1350_v13 = vld [vmem:[#allocation2 + $0x160] sm:$0xff]  ;;  %569 = vmatpush.msra.mxu2 %v1346_v1  ;;  %v1368_v19 = vld [vmem:[#allocation2 + $0xf8] sm:$0xff]  ;;  %v1380_v23 = vld [vmem:[#allocation2 + $0x28] sm:$0xff] }
  0x5b   : > { %v1354_v14 = vld [vmem:[#allocation2 + $0xc0] sm:$0xff]  ;;  %530 = vmatpush.msra.mxu0 %v1350_v13  ;;  %v1370_v20 = vld [vmem:[#allocation2 + $0x38] sm:$0xff]  ;;  %v1382_v24 = vld [vmem:[#allocation2 + $0x190] sm:$0xff] }
  0x5c   : > { %v1358_v16 = vld [vmem:[#allocation2 + $0x1c0] sm:$0xff]  ;;  %589 = vmatpush.msra.mxu3 %v1348_v12  ;;  %550 = vmatpush.msra.mxu1 %v1354_v14  ;;  %v1374_v21 = vld [vmem:[#allocation2 + $0x1b8] sm:$0xff]  ;;  %v1388_v26 = vld [vmem:[#allocation2 + $0x170] sm:$0xff] }
  0x5d   : > { %570 = vmatpush.msra.mxu2 %v1356_v15  ;;  %531 = vmatpush.msra.mxu0 %v1362_v17  ;;  %v1386_v25 = vld [vmem:[#allocation2 + $0x80] sm:$0xff]  ;;  %v1392_v27 = vld [vmem:[#allocation2 + $0x1a8] sm:$0xff]  ;;  %v1394_v28 = vld [vmem:[#allocation2 + $0x178] sm:$0xff] }
  0x5e   : > { %590 = vmatpush.msra.mxu3 %v1358_v16  ;;  %551 = vmatpush.msra.mxu1 %v1364_v18  ;;  %v1398_v29 = vld [vmem:[#allocation2 + $0x138] sm:$0xff]  ;;  %v1400_v30 = vld [vmem:[#allocation2 + $0xa8] sm:$0xff]  ;;  %v1404_v31 = vld [vmem:[#allocation2 + $0x140] sm:$0xff] }
  0x5f   : > { %571 = vmatpush.msra.mxu2 %v1368_v19  ;;  %532 = vmatpush.msra.mxu0 %v1374_v21  ;;  %v1406_v32 = vld [vmem:[#allocation2 + $0x1c8] sm:$0xff]  ;;  %v1410_v33 = vld [vmem:[#allocation2 + $0xe0] sm:$0xff]  ;;  %v1412_v34 = vld [vmem:[#allocation2 + $0xb8] sm:$0xff] }
  0x60   : > { %591 = vmatpush.msra.mxu3 %v1370_v20  ;;  %552 = vmatpush.msra.mxu1 %v1376_v22  ;;  %v1416_v35 = vld [vmem:[#allocation2 + $0x188] sm:$0xff]  ;;  %v1424_v38 = vld [vmem:[#allocation2 + $0x1d8] sm:$0xff]  ;;  %v1428_v39 = vld [vmem:[#allocation2 + $0x60] sm:$0xff] }
  0x61   : > { %572 = vmatpush.msra.mxu2 %v1380_v23  ;;  %533 = vmatpush.msra.mxu0 %v1386_v25  ;;  %v1418_v36 = vld [vmem:[#allocation2 + $0x88] sm:$0xff]  ;;  %v1430_v40 = vld [vmem:[#allocation2 + $0xd0] sm:$0xff]  ;;  %v1434_v41 = vld [vmem:[#allocation2 + $0x120] sm:$0xff] }
  0x62   : > { %592 = vmatpush.msra.mxu3 %v1382_v24  ;;  %553 = vmatpush.msra.mxu1 %v1388_v26  ;;  %v1422_v37 = vld [vmem:[#allocation2 + $0x108] sm:$0xff]  ;;  %v1436_v42 = vld [vmem:[#allocation2 + $0x70] sm:$0xff]  ;;  %v1446_v45 = vld [vmem:[#allocation2 + $0x118] sm:$0xff] }
  0x63   : > { %573 = vmatpush.msra.mxu2 %v1392_v27  ;;  %534 = vmatpush.msra.mxu0 %v1398_v29  ;;  %v1440_v43 = vld [vmem:[#allocation2 + $0x150] sm:$0xff]  ;;  %v1448_v46 = vld [vmem:[#allocation2 + $0xe8] sm:$0xff]  ;;  %v1452_v47 = vld [vmem:[#allocation2 + $0x98] sm:$0xff] }
  0x64   : > { %593 = vmatpush.msra.mxu3 %v1394_v28  ;;  %554 = vmatpush.msra.mxu1 %v1400_v30  ;;  %v1442_v44 = vld [vmem:[#allocation2 + $0x90] sm:$0xff]  ;;  %v1454_v48 = vld [vmem:[#allocation2 + $0x78] sm:$0xff]  ;;  %v1458_v49 = vld [vmem:[#allocation2 + $0x180] sm:$0xff] }
  0x65   : > { %574 = vmatpush.msra.mxu2 %v1404_v31  ;;  %535 = vmatpush.msra.mxu0 %v1410_v33  ;;  %v1460_v50 = vld [vmem:[#allocation2 + $0x1a0] sm:$0xff]  ;;  %v1464_v51 = vld [vmem:[#allocation2 + $0x110] sm:$0xff]  ;;  %v499_v53 = vld [vmem:[%s1205_s15] sm:$0xff] }
  0x66   : > { %594 = vmatpush.msra.mxu3 %v1406_v32  ;;  %555 = vmatpush.msra.mxu1 %v1412_v34  ;;  %v1466_v52 = vld [vmem:[#allocation2 + $0x1f0] sm:$0xff]  ;;  %v1473_v55 = vld [vmem:[#allocation2 + $0x20] sm:$0xff]  ;;  %v500_v56 = vand.u32 2, %v499_v53  ;;  %v506_v57 = vand.u32 4294967292, %v499_v53  ;;  %v1477_v58 = vld [vmem:[#allocation2 + $0x48] sm:$0xff] }
  0x67   : > { %575 = vmatpush.msra.mxu2 %v1416_v35  ;;  %536 = vmatpush.msra.mxu0 %v1422_v37  ;;  %v1471_v54 = vld [vmem:[#allocation2 + $0x130] sm:$0xff]  ;;  %1688 = vst [vmem:[#allocation9_spill] sm:$0xff] %v1477_v58  ;;  %v1479_v59 = vld [vmem:[#allocation2 + $0x128] sm:$0xff]  ;;  %v1485_v61 = vld [vmem:[#allocation2 + $0x40] sm:$0xff] }
  0x68   : > { %595 = vmatpush.msra.mxu3 %v1418_v36  ;;  %556 = vmatpush.msra.mxu1 %v1424_v38  ;;  %1689 = vst [vmem:[#allocation10_spill] sm:$0xff] %v1479_v59  ;;  %v1483_v60 = vld [vmem:[#allocation2 + $0x50] sm:$0xff]  ;;  %v1489_v62 = vld [vmem:[#allocation2 + $0x168] sm:$0xff]  ;;  %v1491_v63 = vld [vmem:[#allocation2 + $0x1f8] sm:$0xff]  ;;  %vm501_vm1 = vcmp.ne.s32.totalorder %v500_v56, 0 }
  0x69   : > { %576 = vmatpush.msra.mxu2 %v1428_v39  ;;  %537 = vmatpush.msra.mxu0 %v1434_v41  ;;  %1690 = vst [vmem:[#allocation11_spill] sm:$0xff] %v1483_v60  ;;  %v1495_v0 = vld [vmem:[#allocation2 + $0xd8] sm:$0xff]  ;;  %v1497_v3 = vld [vmem:[#allocation2 + $0x100] sm:$0xff]  ;;  %v1503_v4 = vld [vmem:[#allocation2 + $0xc8] sm:$0xff] }
  0x6a   : > { %596 = vmatpush.msra.mxu3 %v1430_v40  ;;  %557 = vmatpush.msra.mxu1 %v1436_v42  ;;  %1691 = vst [vmem:[#allocation12_spill] sm:$0xff] %v1485_v61  ;;  %v1501_v2 = vld [vmem:[#allocation2 + $0x18] sm:$0xff]  ;;  %v1507_v5 = vld [vmem:[#allocation2 + $0xb0] sm:$0xff] }
  0x6b   : > { %577 = vmatpush.msra.mxu2 %v1440_v43  ;;  %538 = vmatpush.msra.mxu0 %v1446_v45  ;;  %507 = vst [vmem:[#allocation1] ss:$2 sm:$0xff] %v506_v57  ;;  %v1509_v57 = vld [vmem:[#allocation2 + $0x148] sm:$0xff]  ;;  %v1513_v56 = vld [vmem:[#allocation2 + $0x1b0] sm:$0xff] }
  0x6c   : > { %597 = vmatpush.msra.mxu3 %v1442_v44  ;;  %558 = vmatpush.msra.mxu1 %v1448_v46  ;;  %1692 = vst [vmem:[#allocation13_spill] sm:$0xff] %v1489_v62 }
  0x6d   : > { %578 = vmatpush.msra.mxu2 %v1452_v47  ;;  %539 = vmatpush.msra.mxu0 %v1458_v49  ;;  %1693 = vst [vmem:[#allocation14_spill] sm:$0xff] %v1491_v63 }
  0x6e   : > { %598 = vmatpush.msra.mxu3 %v1454_v48  ;;  %559 = vmatpush.msra.mxu1 %v1460_v50  ;;  %1694 = vst [vmem:[#allocation15_spill] sm:$0xff] %v1495_v0 }
  0x6f   : > { %579 = vmatpush.msra.mxu2 %v1464_v51  ;;  %540 = vmatpush.msra.mxu0 %v1471_v54  ;;  %1695 = vst [vmem:[#allocation16_spill] sm:$0xff] %v1497_v3 }
  0x70   : > { %599 = vmatpush.msra.mxu3 %v1466_v52  ;;  %560 = vmatpush.msra.mxu1 %v1473_v55 }
  0x71   : > { %580 = vmatpush.msra.mxu2 %v1477_v58  ;;  %541 = vmatpush.msra.mxu0 %v1483_v60  ;;  %v1515_v60 = vld [vmem:[#allocation2 + $0x1d0] sm:$0xff]  ;;  %v497_v58 = vld [vmem:[#allocation3] sm:$0xf] }
  0x72   : > { %600 = vmatpush.msra.mxu3 %v1479_v59  ;;  %561 = vmatpush.msra.mxu1 %v1485_v61  ;;  %v1686_v61 = vmov 0.0  }
  0x73   : > { %581 = vmatpush.msra.mxu2 %v1489_v62  ;;  %542 = vmatpush.msra.mxu0 %v1495_v0  ;;  %v1518_v59 = vsel %vm501_vm1, 1.0, %v1686_v61  ;;  %v498_v62 = vld [vmem:[#allocation4] sm:$0xf]  ;;  %v1171_v61 = vmov 0  }
  0x74   : > { %601 = vmatpush.msra.mxu3 %v1491_v63  ;;  %562 = vmatpush.msra.mxu1 %v1497_v3  ;;  %v503_v63 = vand.u32 1, %v499_v53  ;;  %v1524_v3 = vld.sshfl [vmem:[#allocation1] sm:$0xff pattern:$0x75316420]  ;;  %v1697_v53 = vmov 0.0  }
  0x75   : > { %582 = vmatpush.msra.mxu2 %v1501_v2  ;;  %543 = vmatpush.msra.mxu0 %v1507_v5  ;;  %1696 = vst [vmem:[#allocation17_spill] sm:$0xff] %v1524_v3  ;;  %v1526_v0 = vld.sshfl [vmem:[#allocation1 + $0x8] sm:$0xff pattern:$0x75316420] }
  0x76   : > { %602 = vmatpush.msra.mxu3 %v1503_v4  ;;  %563 = vmatpush.msra.mxu1 %v1509_v57  ;;  %513 = vst [vmem:[#allocation1] ss:$2 sm:$0xff] %v1518_v59  ;;  %vm504_vm2 = vcmp.ne.s32.totalorder %v503_v63, 0  ;;  %v1081_v63 = vld [vmem:[%s1205_s15 + $0x8] sm:$0xff] }
  0x77   : > { %583 = vmatpush.msra.mxu2 %v1513_v56  ;;  %1113 = vset.pattern.permute.xlu0 %v1171_v61  ;;  %v1536_v3 = vsel %vm504_vm2, 1.0, %v1697_v53 }
  0x78   : > { %603 = vmatpush.msra.mxu3 %v1515_v60  ;;  %1114 = vset.pattern.permute.xlu1 %v1171_v61  ;;  %v1543_v61 = vld [vmem:[%s1675_s0] sm:$0xf] }
  0x79   : > { %617 = vperm.xlu0 %1113, %v498_v62   ;;  %610 = vperm.xlu1 %1114, %v497_v58  }
  0x7a   : > { %747 = vmatpush.msrb.mxu0 %v1330_v6  ;;  %767 = vmatpush.msrb.mxu1 %v1332_v7 }
  0x7b   : > { %787 = vmatpush.msrb.mxu2 %v1334_v8  ;;  %807 = vmatpush.msrb.mxu3 %v1338_v9 }
  0x7c   : > { %748 = vmatpush.msrb.mxu0 %v1340_v10  ;;  %768 = vmatpush.msrb.mxu1 %v1342_v11 }
  0x7d   : > { %788 = vmatpush.msrb.mxu2 %v1346_v1  ;;  %808 = vmatpush.msrb.mxu3 %v1348_v12  ;;  %v514_v6 = vld.sshfl [vmem:[#allocation1] sm:$0xff pattern:$0x75316420]  ;;  %v515_v7 = vld.sshfl [vmem:[#allocation1 + $0x8] sm:$0xff pattern:$0x75316420] }
  0x7e   : > { %749 = vmatpush.msrb.mxu0 %v1350_v13  ;;  %769 = vmatpush.msrb.mxu1 %v1354_v14  ;;  %520 = vst [vmem:[#allocation1 + $0x1] ss:$2 sm:$0xff] %v1536_v3  ;;  %v1698_v1 = vld [vmem:[#allocation9_spill] sm:$0xff]  ;;  %v1699_v12 = vld [vmem:[#allocation10_spill] sm:$0xff]  ;;  %v1700_v13 = vld [vmem:[#allocation11_spill] sm:$0xff] }
  0x7f   : > { %789 = vmatpush.msrb.mxu2 %v1356_v15  ;;  %809 = vmatpush.msrb.mxu3 %v1358_v16  ;;  %v1701_v14 = vld [vmem:[#allocation12_spill] sm:$0xff]  ;;  %v1702_v15 = vld [vmem:[#allocation13_spill] sm:$0xff]  ;;  %v1703_v16 = vld [vmem:[#allocation14_spill] sm:$0xff] }
  0x80   : > { %750 = vmatpush.msrb.mxu0 %v1362_v17  ;;  %770 = vmatpush.msrb.mxu1 %v1364_v18  ;;  %v1704_v17 = vld [vmem:[#allocation15_spill] sm:$0xff]  ;;  %v1705_v18 = vld [vmem:[#allocation16_spill] sm:$0xff] }
  0x81   : > { %644 = vperm.xlu0 %1113, %v1543_v61   ;;  %790 = vmatpush.msrb.mxu2 %v1368_v19 }
  0x82   : > { %810 = vmatpush.msrb.mxu3 %v1370_v20  ;;  %751 = vmatpush.msrb.mxu0 %v1374_v21 }
  0x83   : > { %771 = vmatpush.msrb.mxu1 %v1376_v22  ;;  %791 = vmatpush.msrb.mxu2 %v1380_v23  ;;  %v1172_v23 = vmov 127  }
  0x84   : > { %811 = vmatpush.msrb.mxu3 %v1382_v24  ;;  %752 = vmatpush.msrb.mxu0 %v1386_v25 }
  0x85   : > { %772 = vmatpush.msrb.mxu1 %v1388_v26  ;;  %792 = vmatpush.msrb.mxu2 %v1392_v27  ;;  %v521_v8 = vld.sshfl [vmem:[#allocation1] sm:$0xff pattern:$0x75316420]  ;;  %v522_v9 = vld.sshfl [vmem:[#allocation1 + $0x8] sm:$0xff pattern:$0x75316420] }
  0x86   : > { %812 = vmatpush.msrb.mxu3 %v1394_v28  ;;  %753 = vmatpush.msrb.mxu0 %v1398_v29  ;;  %v526_v10 = vsel %vm525_vm3, %v514_v6, %v521_v8  ;;  %v527_v11 = vsel %vm525_vm3, %v515_v7, %v522_v9  ;;  %628 = vst [vmem:[#allocation1] ss:$2 sm:$0xff] %v1518_v59 }
  0x87   : > { %773 = vmatpush.msrb.mxu1 %v1400_v30  ;;  %793 = vmatpush.msrb.mxu2 %v1404_v31 }
  0x88   : > { %544 = vmatmul.f32.vlgmr.msra.gmra.mxu0 %v526_v10  ;;  %564 = vmatmul.f32.vlgmr.msra.gmra.mxu1 %v527_v11 }
  0x89   : > { %584 = vmatmul.f32.vlgmr.msra.gmra.mxu2 %v526_v10  ;;  %604 = vmatmul.f32.vlgmr.msra.gmra.mxu3 %v527_v11 }
  0x8a   : > { %813 = vmatpush.msrb.mxu3 %v1406_v32  ;;  %754 = vmatpush.msrb.mxu0 %v1410_v33 }
  0x8b   : > { %774 = vmatpush.msrb.mxu1 %v1412_v34  ;;  %794 = vmatpush.msrb.mxu2 %v1416_v35 }
  0x8c   : > { %814 = vmatpush.msrb.mxu3 %v1418_v36  ;;  %755 = vmatpush.msrb.mxu0 %v1422_v37 }
  0x8d   : > { %775 = vmatpush.msrb.mxu1 %v1424_v38  ;;  %795 = vmatpush.msrb.mxu2 %v1428_v39  ;;  %v1608_v19 = vld.sshfl [vmem:[#allocation1] sm:$0xff pattern:$0x75316420]  ;;  %v630_v20 = vld.sshfl [vmem:[#allocation1 + $0x8] sm:$0xff pattern:$0x75316420] }
  0x8e   : > { %815 = vmatpush.msrb.mxu3 %v1430_v40  ;;  %756 = vmatpush.msrb.mxu0 %v1434_v41  ;;  %635 = vst [vmem:[#allocation1] ss:$2 sm:$0xff] %v1536_v3 }
  0x8f   : > { %776 = vmatpush.msrb.mxu1 %v1436_v42  ;;  %796 = vmatpush.msrb.mxu2 %v1440_v43 }
  0x90   : > { %816 = vmatpush.msrb.mxu3 %v1442_v44  ;;  %757 = vmatpush.msrb.mxu0 %v1446_v45 }
  0x91   : > { %777 = vmatpush.msrb.mxu1 %v1448_v46  ;;  %797 = vmatpush.msrb.mxu2 %v1452_v47 }
  0x92   : > { %817 = vmatpush.msrb.mxu3 %v1454_v48  ;;  %758 = vmatpush.msrb.mxu0 %v1458_v49 }
  0x93   : > { %778 = vmatpush.msrb.mxu1 %v1460_v50  ;;  %798 = vmatpush.msrb.mxu2 %v1464_v51 }
  0x94   : > { %818 = vmatpush.msrb.mxu3 %v1466_v52  ;;  %759 = vmatpush.msrb.mxu0 %v1471_v54 }
  0x95   : > { %779 = vmatpush.msrb.mxu1 %v1473_v55  ;;  %799 = vmatpush.msrb.mxu2 %v1698_v1  ;;  %v636_v21 = vld.sshfl [vmem:[#allocation1] sm:$0xff pattern:$0x75316420]  ;;  %v637_v22 = vld.sshfl [vmem:[#allocation1 + $0x8] sm:$0xff pattern:$0x75316420] }
  0x96   : > { %819 = vmatpush.msrb.mxu3 %v1699_v12  ;;  %760 = vmatpush.msrb.mxu0 %v1700_v13  ;;  %653 = vst [vmem:[#allocation1] ss:$2 sm:$0xff] %v1536_v3 }
  0x97   : > { %780 = vmatpush.msrb.mxu1 %v1701_v14  ;;  %800 = vmatpush.msrb.mxu2 %v1702_v15 }
  0x98   : > { %820 = vmatpush.msrb.mxu3 %v1703_v16  ;;  %761 = vmatpush.msrb.mxu0 %v1704_v17 }
  0x99   : > { %781 = vmatpush.msrb.mxu1 %v1705_v18  ;;  %801 = vmatpush.msrb.mxu2 %v1501_v2  ;;  %v720_v2 = vand.u32 2, %v1081_v63  ;;  %v723_v18 = vand.u32 1, %v1081_v63 }
  0x9a   : > { %821 = vmatpush.msrb.mxu3 %v1503_v4  ;;  %762 = vmatpush.msrb.mxu0 %v1507_v5  ;;  %v726_v4 = vand.u32 4294967292, %v1081_v63 }
  0x9b   : > { %782 = vmatpush.msrb.mxu1 %v1509_v57  ;;  %802 = vmatpush.msrb.mxu2 %v1513_v56  ;;  %vm721_vm4 = vcmp.ne.s32.totalorder %v720_v2, 0  ;;  %vm724_vm13 = vcmp.ne.s32.totalorder %v723_v18, 0 }
  0x9c   : > { %822 = vmatpush.msrb.mxu3 %v1515_v60  ;;  %1116 = vset.pattern.permute.xlu2 %v1172_v23  ;;  %v1625_v17 = vsel %vm721_vm4, 1.0, %v1697_v53 }
  0x9d   : > { %1115 = vset.pattern.permute.xlu1 %v1172_v23  ;;  %1117 = vset.pattern.permute.xlu0 %v1172_v23  ;;  %v655_v55 = vld.sshfl [vmem:[#allocation1 + $0x8] sm:$0xff pattern:$0x75316420]  ;;  %v654_v58 = vld.sshfl [vmem:[#allocation1] sm:$0xff pattern:$0x75316420] }
  0xeb   : > { %v618_v24 = vpop.permute.xlu0 %617  ;;  %v611_v36 = vpop.permute.xlu1 %610 }
  0xf3   : > { %v1612_v29 = vpop.permute.xlu0 %644 }
 0x105   : > { %v545_v25 = vpop.f32.mrf.mxu0  ;;  %v565_v26 = vpop.f32.mrf.mxu1 }
 0x106   : > { %v566_v27 = vadd.f32 %v565_v26, %v545_v25 }
 0x108   : > { %v622_v28 = vrot.slane %v566_v27, 4  ;;  %v613_v62 = vadd.f32 %v611_v36, %v566_v27 }
 0x10a   : > { %v626_v30 = vadd.f32 %v622_v28, %v618_v24  ;;  %v633_v5 = vsub.f32 %v613_v62, %v1608_v19 }
 0x10c   : > { %v640_v31 = vsub.f32 %v626_v30, %v636_v21  ;;  %v585_v32 = vpop.f32.mrf.mxu2  ;;  %v605_v33 = vpop.f32.mrf.mxu3  ;;  %v651_v34 = vadd.f32 %v1612_v29, %v626_v30  ;;  %v647_v10 = vsub.f32 %v1612_v29, %v633_v5 }
 0x10d   : > { %v606_v35 = vadd.f32 %v605_v33, %v585_v32 }
 0x10e   : > { %v649_v37 = vadd.f32 %v1612_v29, %v640_v31  ;;  %v674_v41 = vmax.f32 %v651_v34, 1e-09 }
 0x10f   : > { %v623_v38 = vrot.slane %v606_v35, 4  ;;  %v614_v39 = vadd.f32 %v611_v36, %v606_v35  ;;  %v725_v36 = vsel %vm724_vm13, 1.0, %v1697_v53 }
 0x110   : > { %v676_v40 = vmax.f32 %v649_v37, 1e-09 }
 0x111   : > { %829 = vperm.xlu2 %1116, %v614_v39   ;;  %v627_v42 = vadd.f32 %v623_v38, %v618_v24  ;;  %v634_v57 = vsub.f32 %v614_v39, %v630_v20  ;;  %v1708_v38 = vld [vmem:[#allocation17_spill] sm:$0xff] }
 0x112   : > { %v678_v43 = vmul.f32 %v676_v40, %v674_v41 }
 0x113   : > { %836 = vperm.xlu1 %1115, %v627_v42   ;;  %v641_v44 = vsub.f32 %v627_v42, %v637_v22  ;;  %v652_v45 = vadd.f32 %v1612_v29, %v627_v42  ;;  %v658_v22 = vmul.f32 %v654_v58, %v647_v10 }
 0x114   : > { %1118 = vrcp.f32 %v678_v43  ;;  %v689_v12 = vand.u32 2147483647, %v678_v43  ;;  %v691_v14 = vand.u32 2147483648, %v678_v43  ;;  %vm685_vm7 = vweird.f32 %v678_v43 }
 0x115   : > { %v650_v46 = vadd.f32 %v1612_v29, %v641_v44  ;;  %v675_v48 = vmax.f32 %v652_v45, 1e-09 }
 0x116   : > { %vm690_vm11 = vcmp.eq.f32.partialorder %v689_v12, 8.507059e+37  ;;  %v692_v25 = vor.u32 1.1754944e-38, %v691_v14 }
 0x117   : > { %v662_v47 = vrot.slane %v650_v46, 4  ;;  %v677_v49 = vmax.f32 %v650_v46, 1e-09 }
 0x119   : > { %v663_v50 = vsel %vm525_vm3, %v649_v37, %v662_v47  ;;  %v679_v51 = vmul.f32 %v677_v49, %v675_v48 }
 0x11a   : > { %v1119_v52 = vpop.eup %1118  ;;  %v665_v54 = vmul.f32 %v663_v50, %v1518_v59  ;;  %v648_v59 = vsub.f32 %v1612_v29, %v634_v57 }
 0x11b   : > { %1120 = vrcp.f32 %v679_v51  ;;  %v681_v60 = vmul.f32 %v1119_v52, %v678_v43  ;;  %vm686_vm5 = vweird.f32 %v1119_v52  ;;  %v706_v13 = vand.u32 2147483648, %v679_v51 }
 0x11c   : > { %667 = vst [vmem:[#allocation1] ss:$2 sm:$0xff] %v665_v54  ;;  %v704_v16 = vand.u32 2147483647, %v679_v51  ;;  %vm1627_vm8 = vmor %vm685_vm7, %vm686_vm5  ;;  %vm700_vm9 = vweird.f32 %v679_v51  ;;  %v659_v21 = vmul.f32 %v655_v55, %v648_v59  ;;  %vm936_vm7 = vcmask 3072  }
 0x11d   : > { %v682_v3 = vsub.f32 1.0, %v681_v60  ;;  %v707_v24 = vor.u32 1.1754944e-38, %v706_v13 }
 0x11e   : > { %vm705_vm12 = vcmp.eq.f32.partialorder %v704_v16, 8.507059e+37 }
 0x11f   : > { %v683_v6 = vmul.f32 %v1119_v52, %v682_v3 }
 0x121   : > { %v1121_v56 = vpop.eup %1120  ;;  %v684_v1 = vadd.f32 %v1119_v52, %v683_v6 }
 0x122   : > { %v696_v7 = vmul.f32 %v1121_v56, %v679_v51  ;;  %vm701_vm6 = vweird.f32 %v1121_v56 }
 0x123   : > { %v668_v8 = vld.sshfl [vmem:[#allocation1] sm:$0xff pattern:$0x75316420]  ;;  %v669_v9 = vld.sshfl [vmem:[#allocation1 + $0x8] sm:$0xff pattern:$0x75316420]  ;;  %v688_v23 = vsel %vm1627_vm8, %v1119_v52, %v684_v1  ;;  %vm702_vm10 = vmor %vm700_vm9, %vm701_vm6 }
 0x124   : > { %v697_v11 = vsub.f32 1.0, %v696_v7  ;;  %727 = vst [vmem:[#allocation1] ss:$2 sm:$0xff] %v726_v4  ;;  %v672_v27 = vadd.f32 %v668_v8, %v658_v22  ;;  %v673_v28 = vadd.f32 %v669_v9, %v659_v21  ;;  %v693_v33 = vsel %vm690_vm11, %v692_v25, %v688_v23 }
 0x126   : > { %v698_v15 = vmul.f32 %v1121_v56, %v697_v11  ;;  %v694_v35 = vmul.f32 %v693_v33, %v672_v27 }
 0x128   : > { %v699_v20 = vadd.f32 %v1121_v56, %v698_v15  ;;  %v710_v39 = vmul.f32 %v694_v35, %v1708_v38 }
 0x12a   : > { %v703_v26 = vsel %vm702_vm10, %v1121_v56, %v699_v20  ;;  %v712_v43 = vsel %vm525_vm3, %v710_v39, 0.0 }
 0x12b   : > { %v708_v30 = vsel %vm705_vm12, %v707_v24, %v703_v26  ;;  %v1633_v31 = vld.sshfl [vmem:[#allocation1] sm:$0xff pattern:$0x75316420]  ;;  %v1635_v32 = vld.sshfl [vmem:[#allocation1 + $0x8] sm:$0xff pattern:$0x75316420] }
 0x12c   : > { %733 = vst [vmem:[#allocation1] ss:$2 sm:$0xff] %v1625_v17  ;;  %v709_v34 = vmul.f32 %v708_v30, %v673_v28 }
 0x12e   : > { %v711_v37 = vmul.f32 %v709_v34, %v1526_v0 }
 0x130   : > { %v713_v42 = vsel %vm525_vm3, %v711_v37, 0.0 }
 0x131   : > { %v714_v44 = vadd.f32 %v713_v42, %v712_v43 }
 0x133   : > { %v735_v40 = vld.sshfl [vmem:[#allocation1 + $0x8] sm:$0xff pattern:$0x75316420]  ;;  %v734_v41 = vld.sshfl [vmem:[#allocation1] sm:$0xff pattern:$0x75316420] }
 0x134   : > { %740 = vst [vmem:[#allocation1 + $0x1] ss:$2 sm:$0xff] %v725_v36 }
 0x13a   : > { %715 = vadd.xlane.f32.xlu2 %v714_v44 }
 0x13b   : > { %v741_v45 = vld.sshfl [vmem:[#allocation1] sm:$0xff pattern:$0x75316420]  ;;  %v742_v46 = vld.sshfl [vmem:[#allocation1 + $0x8] sm:$0xff pattern:$0x75316420] }
 0x13c   : > { %v745_v47 = vsel %vm525_vm3, %v734_v41, %v741_v45  ;;  %v746_v48 = vsel %vm525_vm3, %v735_v40, %v742_v46  ;;  %847 = vst [vmem:[#allocation1] ss:$2 sm:$0xff] %v1625_v17 }
 0x13d   : > { %763 = vmatmul.f32.vlgmr.msrb.gmra.mxu0 %v745_v47  ;;  %783 = vmatmul.f32.vlgmr.msrb.gmra.mxu1 %v746_v48 }
 0x13e   : > { %803 = vmatmul.f32.vlgmr.msrb.gmra.mxu2 %v745_v47  ;;  %823 = vmatmul.f32.vlgmr.msrb.gmra.mxu3 %v746_v48 }
 0x143   : > { %v1646_v0 = vld.sshfl [vmem:[#allocation1 + $0x8] sm:$0xff pattern:$0x75316420]  ;;  %v848_v53 = vld.sshfl [vmem:[#allocation1] sm:$0xff pattern:$0x75316420] }
 0x144   : > { %854 = vst [vmem:[#allocation1] ss:$2 sm:$0xff] %v725_v36 }
 0x14b   : > { %v855_v49 = vld.sshfl [vmem:[#allocation1] sm:$0xff pattern:$0x75316420]  ;;  %v856_v50 = vld.sshfl [vmem:[#allocation1 + $0x8] sm:$0xff pattern:$0x75316420] }
 0x14c   : > { %867 = vst [vmem:[#allocation1] ss:$2 sm:$0xff] %v725_v36 }
 0x153   : > { %v868_v22 = vld.sshfl [vmem:[#allocation1] sm:$0xff pattern:$0x75316420]  ;;  %v869_v23 = vld.sshfl [vmem:[#allocation1 + $0x8] sm:$0xff pattern:$0x75316420] }
 0x16b   : > { %v830_v5 = vpop.permute.xlu2 %829 }
 0x185   : > { %v837_v58 = vpop.permute.xlu1 %836 }
 0x1ba   : > { %v764_v51 = vpop.f32.mrf.mxu0  ;;  %v784_v52 = vpop.f32.mrf.mxu1 }
 0x1bb   : > { %v785_v54 = vadd.f32 %v784_v52, %v764_v51 }
 0x1bd   : > { %v841_v55 = vrot.slane %v785_v54, 4  ;;  %v832_v12 = vadd.f32 %v830_v5, %v785_v54 }
 0x1bf   : > { %v845_v60 = vadd.f32 %v841_v55, %v837_v58  ;;  %v852_v20 = vsub.f32 %v832_v12, %v848_v53 }
 0x1c1   : > { %v859_v62 = vsub.f32 %v845_v60, %v855_v49  ;;  %v865_v63 = vadd.f32 %v845_v60, %v1612_v29  ;;  %v804_v3 = vpop.f32.mrf.mxu2  ;;  %v824_v2 = vpop.f32.mrf.mxu3  ;;  %v861_v26 = vsub.f32 %v1612_v29, %v852_v20 }
 0x1c2   : > { %v825_v4 = vadd.f32 %v824_v2, %v804_v3  ;;  %v716_v2 = vpop.xlane.xlu2 %715 }
 0x1c3   : > { %v863_v57 = vadd.f32 %v859_v62, %v1612_v29  ;;  %v888_v7 = vmax.f32 %v865_v63, 1e-09  ;;  %v872_v36 = vmul.f32 %v868_v22, %v861_v26 }
 0x1c4   : > { %v833_v56 = vadd.f32 %v830_v5, %v825_v4  ;;  %v842_v6 = vrot.slane %v825_v4, 4  ;;  %v943_v4 = vld [vmem:[#allocation5] sm:$0xf] }
 0x1c5   : > { %v890_v8 = vmax.f32 %v863_v57, 1e-09 }
 0x1c6   : > { %933 = vrot.lane.b32.xlu1 %v833_v56, %s1173_s18  ;;  %v846_v9 = vadd.f32 %v842_v6, %v837_v58  ;;  %v853_v30 = vsub.f32 %v833_v56, %v1646_v0 }
 0x1c7   : > { %v892_v59 = vmul.f32 %v890_v8, %v888_v7 }
 0x1c8   : > { %v860_v10 = vsub.f32 %v846_v9, %v856_v50  ;;  %v866_v11 = vadd.f32 %v846_v9, %v1612_v29  ;;  %v862_v40 = vsub.f32 %v1612_v29, %v853_v30 }
 0x1c9   : > { %1122 = vrcp.f32 %v892_v59  ;;  %v905_v28 = vand.u32 2147483648, %v892_v59  ;;  %v903_v33 = vand.u32 2147483647, %v892_v59  ;;  %vm899_vm15 = vweird.f32 %v892_v59 }
 0x1ca   : > { %v864_v1 = vadd.f32 %v860_v10, %v1612_v29  ;;  %v889_v14 = vmax.f32 %v866_v11, 1e-09  ;;  %v873_v48 = vmul.f32 %v869_v23, %v862_v40 }
 0x1cb   : > { %v906_v39 = vor.u32 1.1754944e-38, %v905_v28  ;;  %vm904_vm1 = vcmp.eq.f32.partialorder %v903_v33, 8.507059e+37 }
 0x1cc   : > { %v876_v13 = vrot.slane %v864_v1, 4  ;;  %v891_v15 = vmax.f32 %v864_v1, 1e-09 }
 0x1ce   : > { %v893_v16 = vmul.f32 %v891_v15, %v889_v14  ;;  %939 = vrot.lane.b32.xlu1 %v846_v9, %s1173_s18  ;;  %v877_v18 = vsel %vm525_vm3, %v863_v57, %v876_v13 }
 0x1cf   : > { %v1123_v19 = vpop.eup %1122  ;;  %v879_v21 = vmul.f32 %v877_v18, %v1625_v17 }
 0x1d0   : > { %1124 = vrcp.f32 %v893_v16  ;;  %v895_v24 = vmul.f32 %v1123_v19, %v892_v59  ;;  %vm900_vm14 = vweird.f32 %v1123_v19  ;;  %v920_v44 = vand.u32 2147483648, %v893_v16 }
 0x1d1   : > { %881 = vst [vmem:[#allocation1] ss:$2 sm:$0xff] %v879_v21  ;;  %vm901_vm0 = vmor %vm899_vm15, %vm900_vm14  ;;  %v918_v46 = vand.u32 2147483647, %v893_v16  ;;  %vm914_vm4 = vweird.f32 %v893_v16 }
 0x1d2   : > { %v896_v25 = vsub.f32 1.0, %v895_v24  ;;  %v921_v49 = vor.u32 1.1754944e-38, %v920_v44 }
 0x1d3   : > { %vm919_vm6 = vcmp.eq.f32.partialorder %v918_v46, 8.507059e+37 }
 0x1d4   : > { %v897_v27 = vmul.f32 %v1123_v19, %v896_v25 }
 0x1d6   : > { %v1125_v34 = vpop.eup %1124  ;;  %v898_v35 = vadd.f32 %v1123_v19, %v897_v27 }
 0x1d7   : > { %v910_v17 = vmul.f32 %v1125_v34, %v893_v16  ;;  %vm915_vm2 = vweird.f32 %v1125_v34 }
 0x1d8   : > { %v882_v37 = vld.sshfl [vmem:[#allocation1] sm:$0xff pattern:$0x75316420]  ;;  %v902_v38 = vsel %vm901_vm0, %v1123_v19, %v898_v35  ;;  %v883_v47 = vld.sshfl [vmem:[#allocation1 + $0x8] sm:$0xff pattern:$0x75316420]  ;;  %vm916_vm5 = vmor %vm914_vm4, %vm915_vm2 }
 0x1d9   : > { %v886_v41 = vadd.f32 %v882_v37, %v872_v36  ;;  %v911_v42 = vsub.f32 1.0, %v910_v17  ;;  %v907_v43 = vsel %vm904_vm1, %v906_v39, %v902_v38  ;;  %v887_v50 = vadd.f32 %v883_v47, %v873_v48 }
 0x1db   : > { %v912_v45 = vmul.f32 %v1125_v34, %v911_v42  ;;  %v908_v0 = vmul.f32 %v907_v43, %v886_v41 }
 0x1dd   : > { %v913_v53 = vadd.f32 %v1125_v34, %v912_v45  ;;  %v924_v54 = vmul.f32 %v908_v0, %v1633_v31 }
 0x1df   : > { %v917_v51 = vsel %vm916_vm5, %v1125_v34, %v913_v53  ;;  %v926_v58 = vsel %vm525_vm3, %v924_v54, 0.0 }
 0x1e0   : > { %v922_v52 = vsel %vm919_vm6, %v921_v49, %v917_v51 }
 0x1e1   : > { %v923_v29 = vmul.f32 %v922_v52, %v887_v50 }
 0x1e3   : > { %v925_v55 = vmul.f32 %v923_v29, %v1635_v32 }
 0x1e5   : > { %v927_v60 = vsel %vm525_vm3, %v925_v55, 0.0 }
 0x1e6   : > { %v928_v62 = vadd.f32 %v927_v60, %v926_v58 }
 0x1e8   : > { %929 = vadd.xlane.f32.xlu0 %v928_v62 }
 0x238   : > { %v934_v63 = vpop.permute.xlu1 %933 }
 0x239   : > { %937 = vst.msk [vmem:[#allocation3] sm:$0xf] %vm936_vm7, %v934_v63 }
 0x240   : > { %v940_v3 = vpop.permute.xlu1 %939 }
 0x241   : > { %942 = vst.msk [vmem:[#allocation4] sm:$0xf] %vm936_vm7, %v940_v3 }
 0x25b   : > { %v930_v5 = vpop.xlane.xlu0 %929 }
 0x25c   : > { %v931_v57 = vadd.f32 %v930_v5, %v716_v2  ;;  %949 = sbr.rel (%p1082_p5) target bundleno = 828 (0x33c), region = 36 }
 0x25e   : > { %v944_v31 = vadd.f32 %v943_v4, %v931_v57 }
 0x260   : > { %945 = vst.msk [vmem:[#allocation5] sm:$0xf] %vm936_vm7, %v944_v31 }
 0x261   : > { %vm950_vm3 = vcmp.gt.f32.partialorder %v1543_v61, 0.0  ;;  %v1174_v56 = vmov 0.0   ;;  %vm992_vm12 = vcmask 0  }
 0x262   : > { %v951_v6 = vsel %vm950_vm3, 1.0, %v1174_v56 }
 0x263   : > { %v965_v9 = vsel %vm936_vm7, %v951_v6, 0.0 }
 0x267   : > { %v952_v32 = vld [vmem:[#allocation5] sm:$0xf] }
 0x268   : > { %v953_v7 = vmul.f32 %v952_v32, %v951_v6 }
 0x26a   : > { %v954_v8 = vsel %vm936_vm7, %v953_v7, 0.0 }
 0x26b   : > { %955 = vadd.xlane.f32.xlu0 %v954_v8 }
 0x273   : > { %966 = vadd.xlane.f32.xlu0 %v965_v9 }
 0x2de   : > { %v956_v59 = vpop.xlane.xlu0 %955 }
 0x2df   : > { %v957_v10 = vrot.slane %v956_v59, 4 }
 0x2e1   : > { %v958_v11 = vadd.f32 %v957_v10, %v956_v59 }
 0x2e3   : > { %v959_v1 = vrot.slane %v958_v11, 2 }
 0x2e5   : > { %v960_v12 = vadd.f32 %v959_v1, %v958_v11 }
 0x2e6   : > { %v967_v13 = vpop.xlane.xlu0 %966 }
 0x2e7   : > { %v968_v14 = vrot.slane %v967_v13, 4  ;;  %v961_v15 = vrot.slane %v960_v12, 1 }
 0x2e9   : > { %v969_v16 = vadd.f32 %v968_v14, %v967_v13  ;;  %v962_v61 = vadd.f32 %v961_v15, %v960_v12 }
 0x2eb   : > { %v970_v18 = vrot.slane %v969_v16, 2  ;;  %1087 = vpush %v962_v61 }
 0x2ed   : > { %v971_v19 = vadd.f32 %v970_v18, %v969_v16 }
 0x2ef   : > { %v972_v20 = vrot.slane %v971_v19, 1 }
 0x2f1   : > { %v973_v21 = vadd.f32 %v972_v20, %v971_v19 }
 0x2f3   : > { %1089 = vpush %v973_v21 }
 0x31c   : > { %s1088_s19 = spop %1087 }
 0x31d   : > { %v964_v36 = vstv %s1088_s19 }
 0x324   : > { %s1090_s20 = spop %1089 }
 0x325   : > { %v975_v22 = vstv %s1090_s20 }
 0x326   : > { %v976_v23 = vmax.f32 %v975_v22, 1.0 }
 0x328   : > { %1126 = vrcp.f32 %v976_v23  ;;  %v988_v27 = vand.u32 2147483648, %v976_v23  ;;  %v986_v30 = vand.u32 2147483647, %v976_v23  ;;  %vm982_vm9 = vweird.f32 %v976_v23 }
 0x32a   : > { %v989_v34 = vor.u32 1.1754944e-38, %v988_v27  ;;  %vm987_vm11 = vcmp.eq.f32.partialorder %v986_v30, 8.507059e+37 }
 0x32e   : > { %v1127_v24 = vpop.eup %1126 }
 0x32f   : > { %v978_v25 = vmul.f32 %v1127_v24, %v976_v23  ;;  %vm983_vm8 = vweird.f32 %v1127_v24 }
 0x330   : > { %vm984_vm10 = vmor %vm982_vm9, %vm983_vm8 }
 0x331   : > { %v979_v26 = vsub.f32 1.0, %v978_v25 }
 0x333   : > { %v980_v28 = vmul.f32 %v1127_v24, %v979_v26 }
 0x335   : > { %v981_v33 = vadd.f32 %v1127_v24, %v980_v28 }
 0x337   : > { %v985_v35 = vsel %vm984_vm10, %v1127_v24, %v981_v33 }
 0x338   : > { %v990_v17 = vsel %vm987_vm11, %v989_v34, %v985_v35 }
 0x339   : > { %v991_v37 = vmul.f32 %v990_v17, %v964_v36 }
 0x33b   : > { %993 = vst.msk [vmem:[#allocation6] sm:$0x1] %vm992_vm12, %v991_v37 }
 0x33c PF: > { %p1095_p6 = scmp.eq.s32.totalorder %s1197_s10, 1  ;;  %s1175_s21 = smov [#allocation6]  }
 0x33d   : > { %s1000_s22 = sshll.u32 %s1175_s21, 4  ;;  %s1002_s25 = sshll.u32 %s1677_s2, 4  ;;  %s1001_s22 = int_to_ptr.vmem [resolvable:$true] %s1000_s22  ;;  %s1003_s25 = int_to_ptr.hbm [resolvable:$true] %s1002_s25 }
 0x33e   : > { %1092 = dma.vmem_to_hbm [thread:$0]  (%p1095_p6), %s1001_s22, 16, %s1003_s25, [#allocation7]  }
 0x33f   : > { %1161 = dma.done.wait (%p1095_p6), [#allocation7], 16  }
 0x340   : > { %1163 = vsyncadd (%p1095_p6), [#allocation7], 4294967280 }
 0x341 PF: > { %s13_s9 = sadd.s32 1, %s1166_s9  }
 0x342   : > { %p10_p7 = scmp.ge.s32.totalorder %s13_s9, 4  }
 0x344   :  { %12 = sbr.rel (!%p10_p7) target bundleno = 1 (0x1), region = 66 }
 0x349   :  { %1016 = vsyncpa [#allocation7], 1 }
 0x34a   :  { %1018 = vsyncpa [#allocation7 + $0x1], 1 }

</bundles_post_ra>
